<compile_context>
chip_gen: v5e
topology: v5e:2x2
jax: 0.10.0
libtpu: 0.0.40
codegen_flags: <defaults>
</compile_context>

<pallas_src>
import functools

import jax
import jax.numpy as jnp
import numpy as np
from jax.experimental import pallas as pl
from jax.experimental.pallas import tpu as pltpu


# Set to jnp.bfloat16 on v6e/v7x to halve spectral-weight HBM traffic (kernel
# upcasts per-channel slab to f32).  Kept at f32 here for exact parity with
# the PyTorch reference numerics.
SPECTRAL_WEIGHT_DTYPE = jnp.float32

# Target resident bytes per pallas_call grid step (double-buffered blocks).
_VMEM_BLOCK_BUDGET = 40 << 20


def _vmem_limit(block_bytes):
    """Explicit scoped-VMEM limit from the computed block footprint."""
    return int(min(56 << 20, max(32 << 20, block_bytes * 5 // 4 + (2 << 20))))


# ----------------------------------------------------------------------------
# In-kernel exact GELU (erf via Abramowitz & Stegun 7.1.26, |err| ~ 1.5e-7,
# matches torch.nn.functional.gelu default to f32 precision).
# ----------------------------------------------------------------------------
def _gelu_exact(x):
    z = x * 0.7071067811865476
    sign = jnp.where(z >= 0, 1.0, -1.0)
    za = jnp.abs(z)
    t = 1.0 / (1.0 + 0.3275911 * za)
    poly = ((((1.061405429 * t - 1.453152027) * t + 1.421413741) * t
             - 0.284496736) * t + 0.254829592) * t
    erf = sign * (1.0 - poly * jnp.exp(-za * za))
    return 0.5 * x * (1.0 + erf)


def _choose_tile(n, max_tile):
    """Largest multiple of 128 that divides n, capped at max_tile (0 if none)."""
    best = 0
    c = 128
    top = min(n, max_tile)
    while c <= top:
        if n % c == 0:
            best = c
        c += 128
    return best


# ----------------------------------------------------------------------------
# Pallas kernel 1: lane-dense fused 1x1 conv / linear (+ skip add + GELU)
#   out[:, tile] = act( W @ x[:, tile] + bias + skip[:, tile] )
# Blocks: x (Cin, tile_n), skip/out (Cout, tile_n) -> unmasked 128-lane stores.
# Weight/bias block index is constant across the whole grid, so they are
# DMA'd once and stay resident.
# ----------------------------------------------------------------------------
def _conv1x1_kernel(*refs, apply_act, has_skip):
    if has_skip:
        x_ref, w_ref, b_ref, s_ref, o_ref = refs
    else:
        x_ref, w_ref, b_ref, o_ref = refs
        s_ref = None
    y = jnp.dot(w_ref[...], x_ref[...], preferred_element_type=jnp.float32)
    y = y + b_ref[...]                       # (Cout, 1) broadcasts over lanes
    if s_ref is not None:
        y = y + s_ref[...]
    if apply_act:
        y = _gelu_exact(y)
    o_ref[...] = y.astype(o_ref.dtype)


def fused_conv1x1(x_cf, w, b, skip=None, apply_act=False, max_tile=8192):
    """Per-position affine map in channel-first layout.

    x_cf: (B, Cin, N) f32;  w: (Cout, Cin) (torch layout, used directly);
    b: (Cout,);  skip: (B, Cout, N) or None.  Returns (B, Cout, N) f32.
    """
    B, Cin, N = x_cf.shape
    Cout = w.shape[0]
    w = jnp.asarray(w, jnp.float32)
    b2 = jnp.asarray(b, jnp.float32).reshape(Cout, 1)

    # Double-buffered f32 streams per lane: x (Cin), out (Cout), skip (Cout).
    n_streams = Cin + Cout * (2 if skip is not None else 1)
    per_lane = 2 * 4 * n_streams
    cap_vmem = max(128, (_VMEM_BLOCK_BUDGET // per_lane) // 128 * 128)
    tile_cap = min(max_tile, cap_vmem)

    tile = _choose_tile(N, tile_cap)
    if tile == 0:
        # Rare fallback: N not a multiple of 128 -> pad once (costs one copy).
        pad = (-N) % 128
        x_cf = jnp.pad(x_cf, ((0, 0), (0, 0), (0, pad)))
        if skip is not None:
            skip = jnp.pad(skip, ((0, 0), (0, 0), (0, pad)))
        Np = N + pad
        tile = _choose_tile(Np, tile_cap)
    else:
        Np = N

    blk_bytes = per_lane * tile + 2 * 4 * Cout * (Cin + 1)

    in_specs = [
        pl.BlockSpec((None, Cin, tile), lambda i, j: (i, 0, j)),
        pl.BlockSpec((Cout, Cin), lambda i, j: (0, 0)),
        pl.BlockSpec((Cout, 1), lambda i, j: (0, 0)),
    ]
    args = [x_cf, w, b2]
    if skip is not None:
        in_specs.append(pl.BlockSpec((None, Cout, tile), lambda i, j: (i, 0, j)))
        args.append(skip)

    kernel = functools.partial(_conv1x1_kernel, apply_act=apply_act,
                               has_skip=skip is not None)
    out = pl.pallas_call(
        kernel,
        out_shape=jax.ShapeDtypeStruct((B, Cout, Np), jnp.float32),
        grid=(B, Np // tile),
        in_specs=in_specs,
        out_specs=pl.BlockSpec((None, Cout, tile), lambda i, j: (i, 0, j)),
        compiler_params=pltpu.CompilerParams(
            dimension_semantics=("parallel", "parallel"),
            vmem_limit_bytes=_vmem_limit(blk_bytes)),
    )(*args)
    return out[:, :, :N] if Np != N else out


# ----------------------------------------------------------------------------
# Pallas kernel 2: SpectralConv3d per-mode channel contraction
#   out[b, o, m] = sum_i x[b, i, m] * w[i, o, m]   (complex, 4-multiply form)
# Mode index M on the lane axis (padded to 128-multiple); Cin contraction is
# statically unrolled as lane-parallel FMAs.  Grid = (M-blocks, batch) so the
# weight blocks are re-used across the inner batch axis without re-DMA.
# ----------------------------------------------------------------------------
def _spectral_kernel(xr_ref, xi_ref, wr_ref, wi_ref, or_ref, oi_ref, *, cin):
    acc_r = jnp.zeros(or_ref.shape, jnp.float32)
    acc_i = jnp.zeros(oi_ref.shape, jnp.float32)
    for ci in range(cin):                         # static unroll over channels
        xr_c = xr_ref[pl.ds(ci, 1), :]            # (1, tile_m)
        xi_c = xi_ref[pl.ds(ci, 1), :]
        wr_c = wr_ref[ci].astype(jnp.float32)     # (Cout, tile_m)
        wi_c = wi_ref[ci].astype(jnp.float32)
        acc_r = acc_r + (wr_c * xr_c - wi_c * xi_c)
        acc_i = acc_i + (wr_c * xi_c + wi_c * xr_c)
    or_ref[...] = acc_r
    oi_ref[...] = acc_i


def spectral_mode_mul(xr, xi, wr, wi, cout):
    """xr/xi: (B, Cin, Mp) f32; wr/wi: (Cin, Cout, Mp); Mp multiple of 128."""
    B, Cin, Mp = xr.shape
    w_item = wr.dtype.itemsize

    # Per-lane bytes of double-buffered blocks: xr+xi+or+oi (f32) + wr+wi.
    per_lane = 2 * (4 * (2 * Cin + 2 * cout) + w_item * 2 * Cin * cout)
    cap_vmem = max(128, (_VMEM_BLOCK_BUDGET // per_lane) // 128 * 128)
    # Accumulator vreg cap: 2*ceil(Cout/8)*(tile_m/128) vregs <= ~16.
    cap_vreg = 128 * max(1, 16 // (2 * ((cout + 7) // 8)))
    tile_m = _choose_tile(Mp, min(1024, cap_vmem, cap_vreg))
    if tile_m == 0:
        tile_m = 128            # Mp is a multiple of 128, so 128 always divides
    blk_bytes = per_lane * tile_m

    kernel = functools.partial(_spectral_kernel, cin=Cin)
    out_r, out_i = pl.pallas_call(
        kernel,
        out_shape=(jax.ShapeDtypeStruct((B, cout, Mp), jnp.float32),
                   jax.ShapeDtypeStruct((B, cout, Mp), jnp.float32)),
        # Mode axis outermost, batch innermost: weight block index (0,0,m) is
        # constant across consecutive batch steps -> weight re-DMA elided.
        grid=(Mp // tile_m, B),
        in_specs=[
            pl.BlockSpec((None, Cin, tile_m), lambda m, b: (b, 0, m)),
            pl.BlockSpec((None, Cin, tile_m), lambda m, b: (b, 0, m)),
            pl.BlockSpec((Cin, cout, tile_m), lambda m, b: (0, 0, m)),
            pl.BlockSpec((Cin, cout, tile_m), lambda m, b: (0, 0, m)),
        ],
        out_specs=(
            pl.BlockSpec((None, cout, tile_m), lambda m, b: (b, 0, m)),
            pl.BlockSpec((None, cout, tile_m), lambda m, b: (b, 0, m)),
        ),
        compiler_params=pltpu.CompilerParams(
            dimension_semantics=("parallel", "parallel"),
            vmem_limit_bytes=_vmem_limit(blk_bytes)),
    )(xr, xi, wr, wi)
    return out_r, out_i


# ----------------------------------------------------------------------------
# Spectral weight pre-packing (done ONCE at init, not per forward)
# ----------------------------------------------------------------------------
def prep_spectral_weights(ws):
    """ws: 4-tuple of complex (Cin, Cout, m1, m2, m3) corner weights.

    Returns lane-padded real/imag arrays of shape (Cin, Cout, Mp)."""
    cin, cout = ws[0].shape[0], ws[0].shape[1]
    wc = jnp.stack(ws, axis=2).reshape(cin, cout, -1)      # (Cin, Cout, M)
    M = wc.shape[-1]
    pad = (-M) % 128
    pad3 = ((0, 0), (0, 0), (0, pad))
    wr = jnp.pad(jnp.real(wc).astype(jnp.float32), pad3).astype(SPECTRAL_WEIGHT_DTYPE)
    wi = jnp.pad(jnp.imag(wc).astype(jnp.float32), pad3).astype(SPECTRAL_WEIGHT_DTYPE)
    return {"wr": wr, "wi": wi}


# ----------------------------------------------------------------------------
# SpectralConv3d: FFT glue (plain JAX) + Pallas mode multiply
# ----------------------------------------------------------------------------
def spectral_conv3d(h, spw, m1, m2, m3):
    """h: (B, Cin, X, Y, T) f32; spw: pre-packed weights (see above)."""
    B, Cin, X, Y, T = h.shape
    Cout = spw["wr"].shape[1]
    Mp = spw["wr"].shape[-1]
    M = 4 * m1 * m2 * m3
    Tr = T // 2 + 1
    assert 2 * m1 <= X and 2 * m2 <= Y and m3 <= Tr, "mode corners would overlap"

    # TODO(synk): rfftn/irfftn stay in plain JAX — no Pallas FFT primitive.
    x_ft = jnp.fft.rfftn(h, axes=(2, 3, 4))           # (B, Cin, X, Y, Tr) c64

    c1 = x_ft[:, :, :m1, :m2, :m3]
    c2 = x_ft[:, :, -m1:, :m2, :m3]
    c3 = x_ft[:, :, :m1, -m2:, :m3]
    c4 = x_ft[:, :, -m1:, -m2:, :m3]
    xc = jnp.stack([c1, c2, c3, c4], axis=2).reshape(B, Cin, -1)   # (B,Cin,M)

    pad3 = ((0, 0), (0, 0), (0, Mp - M))
    xr = jnp.pad(jnp.real(xc).astype(jnp.float32), pad3)
    xi = jnp.pad(jnp.imag(xc).astype(jnp.float32), pad3)

    o_r, o_i = spectral_mode_mul(xr, xi, spw["wr"], spw["wi"], Cout)
    oc = (o_r[:, :, :M] + 1j * o_i[:, :, :M]).reshape(B, Cout, 4, m1, m2, m3)

    # TODO(synk): full-spectrum zeros + corner scatter stays in XLA; fusing it
    # into the (non-Pallas) irfftn is not expressible without a custom FFT.
    out_ft = jnp.zeros((B, Cout, X, Y, Tr), dtype=jnp.complex64)
    out_ft = out_ft.at[:, :, :m1, :m2, :m3].set(oc[:, :, 0])
    out_ft = out_ft.at[:, :, -m1:, :m2, :m3].set(oc[:, :, 1])
    out_ft = out_ft.at[:, :, :m1, -m2:, :m3].set(oc[:, :, 2])
    out_ft = out_ft.at[:, :, -m1:, -m2:, :m3].set(oc[:, :, 3])

    return jnp.fft.irfftn(out_ft, s=(X, Y, T), axes=(2, 3, 4))


# ----------------------------------------------------------------------------
# FNO3d_Backbone forward (channel-first in, channel-first out; no relayouts)
# ----------------------------------------------------------------------------
def backbone_forward(x_cf, p, layers, modes1, modes2, modes3, pad_ratio=(0.0, 0.0)):
    """x_cf: (B, Din, X, Y, T) -> (B, layers[-1], X, Y, T)."""
    B, Din, X, Y, T = x_cf.shape

    # fc0 (Linear over channels) — lane-dense Pallas 1x1-conv kernel
    fc0_w, fc0_b = p["fc0"]
    h = fused_conv1x1(x_cf.reshape(B, Din, X * Y * T), fc0_w, fc0_b)
    h = h.reshape(B, layers[0], X, Y, T)

    # padding along the t axis (default pad_ratio = [0, 0] -> no-op)
    if max(pad_ratio) > 0:
        num_pad = [int(round(T * r)) for r in pad_ratio]
        h = jnp.pad(h, ((0, 0), (0, 0), (0, 0), (0, 0),
                        (num_pad[0], num_pad[1])))
    else:
        num_pad = [0, 0]

    Xp, Yp, Tp = h.shape[2], h.shape[3], h.shape[4]
    Ns = Xp * Yp * Tp
    nlayers = len(layers) - 1
    for i in range(nlayers):
        Cin, Cout = layers[i], layers[i + 1]
        x1 = spectral_conv3d(h, p["sp"][i], modes1[i], modes2[i], modes3[i])
        ww, wb = p["w"][i]
        out = fused_conv1x1(h.reshape(B, Cin, Ns), ww, wb,
                            skip=x1.reshape(B, Cout, Ns),
                            apply_act=(i != nlayers - 1))
        h = out.reshape(B, Cout, Xp, Yp, Tp)

    if max(num_pad) > 0:
        end = h.shape[-1] - num_pad[1] if num_pad[1] > 0 else h.shape[-1]
        h = h[..., num_pad[0]:end]
    return h


# ----------------------------------------------------------------------------
# FNO3d_MAE forward
# ----------------------------------------------------------------------------
def fno3d_mae_forward(params, x, mask, layers, in_dim, modes1, modes2, modes3):
    """x: (B, X, Y, T, in_dim); mask broadcastable. Returns (B, X, Y, T, in_dim)."""
    xm = x * mask
    # single channel-last -> channel-first relayout (in_dim channels only)
    xm_cf = jnp.transpose(xm, (0, 4, 1, 2, 3))

    feat = backbone_forward(xm_cf, params["enc"], layers, modes1, modes2, modes3)
    B, C, X, Y, T = feat.shape

    # encoder_to_decoder Linear == 1x1 conv in channel-first layout (no relayout)
    e2d_w, e2d_b = params["e2d"]
    h = fused_conv1x1(feat.reshape(B, C, X * Y * T), e2d_w, e2d_b)
    h = h.reshape(B, C, X, Y, T)

    layers_dec = list(layers[:-1]) + [in_dim]
    dec = backbone_forward(h, params["dec"], layers_dec, modes1, modes2, modes3)
    return jnp.transpose(dec, (0, 2, 3, 4, 1))        # (B, X, Y, T, in_dim)


# ----------------------------------------------------------------------------
# Deterministic parameter initialization (shapes mirror the torch module);
# spectral weights are pre-packed here, once, never per forward.
# ----------------------------------------------------------------------------
def init_linear(key, out_dim, in_dim):
    k1, k2 = jax.random.split(key)
    bound = 1.0 / np.sqrt(in_dim)
    w = jax.random.uniform(k1, (out_dim, in_dim), jnp.float32, -bound, bound)
    b = jax.random.uniform(k2, (out_dim,), jnp.float32, -bound, bound)
    return w, b


def init_spectral(key, cin, cout, m1, m2, m3):
    scale = 1.0 / (cin * cout)
    ks = jax.random.split(key, 8)
    ws = []
    for j in range(4):
        wr = scale * jax.random.uniform(ks[2 * j], (cin, cout, m1, m2, m3), jnp.float32)
        wi = scale * jax.random.uniform(ks[2 * j + 1], (cin, cout, m1, m2, m3), jnp.float32)
        ws.append(wr + 1j * wi)  # complex64, torch layout
    return prep_spectral_weights(tuple(ws))


def init_backbone(key, layers, in_dim, modes1, modes2, modes3):
    n = len(layers) - 1
    keys = jax.random.split(key, 1 + 2 * n)
    p = {"fc0": init_linear(keys[0], layers[0], in_dim), "sp": [], "w": []}
    for i in range(n):
        p["sp"].append(init_spectral(keys[1 + 2 * i], layers[i], layers[i + 1],
                                     modes1[i], modes2[i], modes3[i]))
        # Conv1d(in, out, 1): weight (out, in, 1) -> stored as (out, in)
        p["w"].append(init_linear(keys[2 + 2 * i], layers[i + 1], layers[i]))
    return p


def init_mae_params(key, layers, in_dim, modes1, modes2, modes3):
    k_enc, k_e2d, k_dec = jax.random.split(key, 3)
    layers_dec = list(layers[:-1]) + [in_dim]
    return {
        "enc": init_backbone(k_enc, layers, in_dim, modes1, modes2, modes3),
        "e2d": init_linear(k_e2d, layers[-1], layers[-1]),
        "dec": init_backbone(k_dec, layers_dec, layers[0], modes1, modes2, modes3),
    }


# ----------------------------------------------------------------------------
if __name__ == "__main__":
    B, X, Y, T = 2, 8, 8, 8
    in_dim = 4
    layers = [8, 8, 8, 8]
    modes1 = [3, 3, 3]
    modes2 = [3, 3, 3]
    modes3 = [2, 2, 2]

    key = jax.random.PRNGKey(0)
    k_x, k_m, k_p = jax.random.split(key, 3)
    x = jax.random.normal(k_x, (B, X, Y, T, in_dim), jnp.float32)
    mask = (jax.random.uniform(k_m, (B, X, Y, T, 1)) > 0.5).astype(jnp.float32)
    params = init_mae_params(k_p, layers, in_dim, modes1, modes2, modes3)

    fwd = jax.jit(functools.partial(
        fno3d_mae_forward,
        layers=layers, in_dim=in_dim,
        modes1=modes1, modes2=modes2, modes3=modes3))

    out = fwd(params, x, mask)
    jax.block_until_ready(out)
    assert out.shape == (B, X, Y, T, in_dim), out.shape
    assert out.dtype == jnp.float32
    print("KERNEL_OK")
</pallas_src>

<mosaic_0001>
module attributes {stable_mosaic.version = 11 : i64} {
  func.func @_conv1x1_kernel(%arg0: i32, %arg1: i32, %arg2: memref<1x4x512xf32, #tpu.memory_space<vmem>>, %arg3: memref<8x4xf32, #tpu.memory_space<vmem>>, %arg4: memref<8x1xf32, #tpu.memory_space<vmem>>, %arg5: memref<1x8x512xf32, #tpu.memory_space<vmem>>) attributes {dimension_semantics = [#tpu.dimension_semantics<parallel>, #tpu.dimension_semantics<parallel>], iteration_bounds = array<i64: 2, 1>, scalar_prefetch = 0 : i64, scratch_operands = 0 : i64, tpu.core_type = #tpu.core_type<tc>, window_params = [{transform_indices = @transform_0, window_bounds = array<i64: 1, 4, 512>}, {pipeline_mode = #tpu.pipeline_mode<synchronous>, transform_indices = @transform_1, window_bounds = array<i64: 8, 4>}, {pipeline_mode = #tpu.pipeline_mode<synchronous>, transform_indices = @transform_2, window_bounds = array<i64: 8, 1>}, {transform_indices = @transform_3, window_bounds = array<i64: 1, 8, 512>}]} {
    %c0 = arith.constant 0 : index
    %c0_0 = arith.constant 0 : index
    %0 = vector.load %arg3[%c0, %c0_0] : memref<8x4xf32, #tpu.memory_space<vmem>>, vector<8x4xf32>
    %c0_1 = arith.constant 0 : index
    %c0_2 = arith.constant 0 : index
    %c0_3 = arith.constant 0 : index
    %1 = vector.load %arg2[%c0_1, %c0_2, %c0_3] : memref<1x4x512xf32, #tpu.memory_space<vmem>>, vector<1x4x512xf32>
    %2 = vector.shape_cast %1 : vector<1x4x512xf32> to vector<4x512xf32>
    %cst = arith.constant dense<0.000000e+00> : vector<8x512xf32>
    %3 = tpu.matmul %0, %2, %cst {dimension_numbers = #tpu.dot_dimension_numbers<[1], [0], [0], [1], [0, 0, 1, 1], [], []>} : vector<8x4xf32>, vector<4x512xf32>, vector<8x512xf32> -> vector<8x512xf32>
    %c0_4 = arith.constant 0 : index
    %c0_5 = arith.constant 0 : index
    %4 = vector.load %arg4[%c0_4, %c0_5] : memref<8x1xf32, #tpu.memory_space<vmem>>, vector<8x1xf32>
    %5 = vector.broadcast %4 : vector<8x1xf32> to vector<8x512xf32>
    %6 = arith.addf %3, %5 : vector<8x512xf32>
    %c0_6 = arith.constant 0 : index
    %c0_7 = arith.constant 0 : index
    %c0_8 = arith.constant 0 : index
    %7 = vector.load %arg5[%c0_6, %c0_7, %c0_8] : memref<1x8x512xf32, #tpu.memory_space<vmem>>, vector<1x8x512xf32>
    %8 = vector.shape_cast %7 : vector<1x8x512xf32> to vector<8x512xf32>
    %9 = vector.shape_cast %6 : vector<8x512xf32> to vector<1x8x512xf32>
    tpu.vector_store %arg5[%c0_6, %c0_7, %c0_8], %9 {strides = array<i32>} : memref<1x8x512xf32, #tpu.memory_space<vmem>>, vector<1x8x512xf32>,
    return
  }
  func.func @transform_0(%arg0: i32, %arg1: i32) -> (i32, i32, i32) {
    %c0_i32 = arith.constant 0 : i32
    %c0_i32_0 = arith.constant 0 : i32
    return %arg0, %c0_i32, %arg1 : i32, i32, i32
  }
  func.func @transform_1(%arg0: i32, %arg1: i32) -> (i32, i32) {
    %c0_i32 = arith.constant 0 : i32
    %c0_i32_0 = arith.constant 0 : i32
    %c0_i32_1 = arith.constant 0 : i32
    return %c0_i32, %c0_i32_0 : i32, i32
  }
  func.func @transform_2(%arg0: i32, %arg1: i32) -> (i32, i32) {
    %c0_i32 = arith.constant 0 : i32
    %c0_i32_0 = arith.constant 0 : i32
    %c0_i32_1 = arith.constant 0 : i32
    return %c0_i32, %c0_i32_0 : i32, i32
  }
  func.func @transform_3(%arg0: i32, %arg1: i32) -> (i32, i32, i32) {
    %c0_i32 = arith.constant 0 : i32
    %c0_i32_0 = arith.constant 0 : i32
    return %arg0, %c0_i32, %arg1 : i32, i32, i32
  }
}

module attributes {stable_mosaic.version = 11 : i64} {
  func.func @_spectral_kernel(%arg0: i32, %arg1: i32, %arg2: memref<1x8x128xf32, #tpu.memory_space<vmem>>, %arg3: memref<1x8x128xf32, #tpu.memory_space<vmem>>, %arg4: memref<8x8x128xf32, #tpu.memory_space<vmem>>, %arg5: memref<8x8x128xf32, #tpu.memory_space<vmem>>, %arg6: memref<1x8x128xf32, #tpu.memory_space<vmem>>, %arg7: memref<1x8x128xf32, #tpu.memory_space<vmem>>) attributes {dimension_semantics = [#tpu.dimension_semantics<parallel>, #tpu.dimension_semantics<parallel>], iteration_bounds = array<i64: 1, 2>, scalar_prefetch = 0 : i64, scratch_operands = 0 : i64, tpu.core_type = #tpu.core_type<tc>, window_params = [{transform_indices = @transform_0, window_bounds = array<i64: 1, 8, 128>}, {transform_indices = @transform_1, window_bounds = array<i64: 1, 8, 128>}, {transform_indices = @transform_2, window_bounds = array<i64: 8, 8, 128>}, {transform_indices = @transform_3, window_bounds = array<i64: 8, 8, 128>}, {transform_indices = @transform_4, window_bounds = array<i64: 1, 8, 128>}, {transform_indices = @transform_5, window_bounds = array<i64: 1, 8, 128>}]} {
    %cst = arith.constant 0.000000e+00 : f32
    %0 = vector.broadcast %cst : f32 to vector<8x128xf32>
    %cst_0 = arith.constant 0.000000e+00 : f32
    %1 = vector.broadcast %cst_0 : f32 to vector<8x128xf32>
    %c0 = arith.constant 0 : index
    %c0_1 = arith.constant 0 : index
    %c0_2 = arith.constant 0 : index
    %2 = vector.load %arg2[%c0, %c0_1, %c0_2] : memref<1x8x128xf32, #tpu.memory_space<vmem>>, vector<1x1x128xf32>
    %3 = vector.shape_cast %2 : vector<1x1x128xf32> to vector<1x128xf32>
    %c0_3 = arith.constant 0 : index
    %c0_4 = arith.constant 0 : index
    %c0_5 = arith.constant 0 : index
    %4 = vector.load %arg3[%c0_3, %c0_4, %c0_5] : memref<1x8x128xf32, #tpu.memory_space<vmem>>, vector<1x1x128xf32>
    %5 = vector.shape_cast %4 : vector<1x1x128xf32> to vector<1x128xf32>
    %c0_6 = arith.constant 0 : index
    %c0_7 = arith.constant 0 : index
    %c0_8 = arith.constant 0 : index
    %6 = vector.load %arg4[%c0_6, %c0_7, %c0_8] : memref<8x8x128xf32, #tpu.memory_space<vmem>>, vector<1x8x128xf32>
    %7 = vector.shape_cast %6 : vector<1x8x128xf32> to vector<8x128xf32>
    %c0_9 = arith.constant 0 : index
    %c0_10 = arith.constant 0 : index
    %c0_11 = arith.constant 0 : index
    %8 = vector.load %arg5[%c0_9, %c0_10, %c0_11] : memref<8x8x128xf32, #tpu.memory_space<vmem>>, vector<1x8x128xf32>
    %9 = vector.shape_cast %8 : vector<1x8x128xf32> to vector<8x128xf32>
    %10 = vector.broadcast %3 : vector<1x128xf32> to vector<8x128xf32>
    %11 = arith.mulf %7, %10 : vector<8x128xf32>
    %12 = vector.broadcast %5 : vector<1x128xf32> to vector<8x128xf32>
    %13 = arith.mulf %9, %12 : vector<8x128xf32>
    %14 = arith.subf %11, %13 : vector<8x128xf32>
    %15 = arith.addf %0, %14 : vector<8x128xf32>
    %16 = vector.broadcast %5 : vector<1x128xf32> to vector<8x128xf32>
    %17 = arith.mulf %7, %16 : vector<8x128xf32>
    %18 = vector.broadcast %3 : vector<1x128xf32> to vector<8x128xf32>
    %19 = arith.mulf %9, %18 : vector<8x128xf32>
    %20 = arith.addf %17, %19 : vector<8x128xf32>
    %21 = arith.addf %1, %20 : vector<8x128xf32>
    %c0_12 = arith.constant 0 : index
    %c1 = arith.constant 1 : index
    %c0_13 = arith.constant 0 : index
    %22 = vector.load %arg2[%c0_12, %c1, %c0_13] : memref<1x8x128xf32, #tpu.memory_space<vmem>>, vector<1x1x128xf32>
    %23 = vector.shape_cast %22 : vector<1x1x128xf32> to vector<1x128xf32>
    %c0_14 = arith.constant 0 : index
    %c1_15 = arith.constant 1 : index
    %c0_16 = arith.constant 0 : index
    %24 = vector.load %arg3[%c0_14, %c1_15, %c0_16] : memref<1x8x128xf32, #tpu.memory_space<vmem>>, vector<1x1x128xf32>
    %25 = vector.shape_cast %24 : vector<1x1x128xf32> to vector<1x128xf32>
    %c1_17 = arith.constant 1 : index
    %c0_18 = arith.constant 0 : index
    %c0_19 = arith.constant 0 : index
    %26 = vector.load %arg4[%c1_17, %c0_18, %c0_19] : memref<8x8x128xf32, #tpu.memory_space<vmem>>, vector<1x8x128xf32>
    %27 = vector.shape_cast %26 : vector<1x8x128xf32> to vector<8x128xf32>
    %c1_20 = arith.constant 1 : index
    %c0_21 = arith.constant 0 : index
    %c0_22 = arith.constant 0 : index
    %28 = vector.load %arg5[%c1_20, %c0_21, %c0_22] : memref<8x8x128xf32, #tpu.memory_space<vmem>>, vector<1x8x128xf32>
    %29 = vector.shape_cast %28 : vector<1x8x128xf32> to vector<8x128xf32>
    %30 = vector.broadcast %23 : vector<1x128xf32> to vector<8x128xf32>
    %31 = arith.mulf %27, %30 : vector<8x128xf32>
    %32 = vector.broadcast %25 : vector<1x128xf32> to vector<8x128xf32>
    %33 = arith.mulf %29, %32 : vector<8x128xf32>
    %34 = arith.subf %31, %33 : vector<8x128xf32>
    %35 = arith.addf %15, %34 : vector<8x128xf32>
    %36 = vector.broadcast %25 : vector<1x128xf32> to vector<8x128xf32>
    %37 = arith.mulf %27, %36 : vector<8x128xf32>
    %38 = vector.broadcast %23 : vector<1x128xf32> to vector<8x128xf32>
    %39 = arith.mulf %29, %38 : vector<8x128xf32>
    %40 = arith.addf %37, %39 : vector<8x128xf32>
    %41 = arith.addf %21, %40 : vector<8x128xf32>
    %c0_23 = arith.constant 0 : index
    %c2 = arith.constant 2 : index
    %c0_24 = arith.constant 0 : index
    %42 = vector.load %arg2[%c0_23, %c2, %c0_24] : memref<1x8x128xf32, #tpu.memory_space<vmem>>, vector<1x1x128xf32>
    %43 = vector.shape_cast %42 : vector<1x1x128xf32> to vector<1x128xf32>
    %c0_25 = arith.constant 0 : index
    %c2_26 = arith.constant 2 : index
    %c0_27 = arith.constant 0 : index
    %44 = vector.load %arg3[%c0_25, %c2_26, %c0_27] : memref<1x8x128xf32, #tpu.memory_space<vmem>>, vector<1x1x128xf32>
    %45 = vector.shape_cast %44 : vector<1x1x128xf32> to vector<1x128xf32>
    %c2_28 = arith.constant 2 : index
    %c0_29 = arith.constant 0 : index
    %c0_30 = arith.constant 0 : index
    %46 = vector.load %arg4[%c2_28, %c0_29, %c0_30] : memref<8x8x128xf32, #tpu.memory_space<vmem>>, vector<1x8x128xf32>
    %47 = vector.shape_cast %46 : vector<1x8x128xf32> to vector<8x128xf32>
    %c2_31 = arith.constant 2 : index
    %c0_32 = arith.constant 0 : index
    %c0_33 = arith.constant 0 : index
    %48 = vector.load %arg5[%c2_31, %c0_32, %c0_33] : memref<8x8x128xf32, #tpu.memory_space<vmem>>, vector<1x8x128xf32>
    %49 = vector.shape_cast %48 : vector<1x8x128xf32> to vector<8x128xf32>
    %50 = vector.broadcast %43 : vector<1x128xf32> to vector<8x128xf32>
    %51 = arith.mulf %47, %50 : vector<8x128xf32>
    %52 = vector.broadcast %45 : vector<1x128xf32> to vector<8x128xf32>
    %53 = arith.mulf %49, %52 : vector<8x128xf32>
    %54 = arith.subf %51, %53 : vector<8x128xf32>
    %55 = arith.addf %35, %54 : vector<8x128xf32>
    %56 = vector.broadcast %45 : vector<1x128xf32> to vector<8x128xf32>
    %57 = arith.mulf %47, %56 : vector<8x128xf32>
    %58 = vector.broadcast %43 : vector<1x128xf32> to vector<8x128xf32>
    %59 = arith.mulf %49, %58 : vector<8x128xf32>
    %60 = arith.addf %57, %59 : vector<8x128xf32>
    %61 = arith.addf %41, %60 : vector<8x128xf32>
    %c0_34 = arith.constant 0 : index
    %c3 = arith.constant 3 : index
    %c0_35 = arith.constant 0 : index
    %62 = vector.load %arg2[%c0_34, %c3, %c0_35] : memref<1x8x128xf32, #tpu.memory_space<vmem>>, vector<1x1x128xf32>
    %63 = vector.shape_cast %62 : vector<1x1x128xf32> to vector<1x128xf32>
    %c0_36 = arith.constant 0 : index
    %c3_37 = arith.constant 3 : index
    %c0_38 = arith.constant 0 : index
    %64 = vector.load %arg3[%c0_36, %c3_37, %c0_38] : memref<1x8x128xf32, #tpu.memory_space<vmem>>, vector<1x1x128xf32>
    %65 = vector.shape_cast %64 : vector<1x1x128xf32> to vector<1x128xf32>
    %c3_39 = arith.constant 3 : index
    %c0_40 = arith.constant 0 : index
    %c0_41 = arith.constant 0 : index
    %66 = vector.load %arg4[%c3_39, %c0_40, %c0_41] : memref<8x8x128xf32, #tpu.memory_space<vmem>>, vector<1x8x128xf32>
    %67 = vector.shape_cast %66 : vector<1x8x128xf32> to vector<8x128xf32>
    %c3_42 = arith.constant 3 : index
    %c0_43 = arith.constant 0 : index
    %c0_44 = arith.constant 0 : index
    %68 = vector.load %arg5[%c3_42, %c0_43, %c0_44] : memref<8x8x128xf32, #tpu.memory_space<vmem>>, vector<1x8x128xf32>
    %69 = vector.shape_cast %68 : vector<1x8x128xf32> to vector<8x128xf32>
    %70 = vector.broadcast %63 : vector<1x128xf32> to vector<8x128xf32>
    %71 = arith.mulf %67, %70 : vector<8x128xf32>
    %72 = vector.broadcast %65 : vector<1x128xf32> to vector<8x128xf32>
    %73 = arith.mulf %69, %72 : vector<8x128xf32>
    %74 = arith.subf %71, %73 : vector<8x128xf32>
    %75 = arith.addf %55, %74 : vector<8x128xf32>
    %76 = vector.broadcast %65 : vector<1x128xf32> to vector<8x128xf32>
    %77 = arith.mulf %67, %76 : vector<8x128xf32>
    %78 = vector.broadcast %63 : vector<1x128xf32> to vector<8x128xf32>
    %79 = arith.mulf %69, %78 : vector<8x128xf32>
    %80 = arith.addf %77, %79 : vector<8x128xf32>
    %81 = arith.addf %61, %80 : vector<8x128xf32>
    %c0_45 = arith.constant 0 : index
    %c4 = arith.constant 4 : index
    %c0_46 = arith.constant 0 : index
    %82 = vector.load %arg2[%c0_45, %c4, %c0_46] : memref<1x8x128xf32, #tpu.memory_space<vmem>>, vector<1x1x128xf32>
    %83 = vector.shape_cast %82 : vector<1x1x128xf32> to vector<1x128xf32>
    %c0_47 = arith.constant 0 : index
    %c4_48 = arith.constant 4 : index
    %c0_49 = arith.constant 0 : index
    %84 = vector.load %arg3[%c0_47, %c4_48, %c0_49] : memref<1x8x128xf32, #tpu.memory_space<vmem>>, vector<1x1x128xf32>
    %85 = vector.shape_cast %84 : vector<1x1x128xf32> to vector<1x128xf32>
    %c4_50 = arith.constant 4 : index
    %c0_51 = arith.constant 0 : index
    %c0_52 = arith.constant 0 : index
    %86 = vector.load %arg4[%c4_50, %c0_51, %c0_52] : memref<8x8x128xf32, #tpu.memory_space<vmem>>, vector<1x8x128xf32>
    %87 = vector.shape_cast %86 : vector<1x8x128xf32> to vector<8x128xf32>
    %c4_53 = arith.constant 4 : index
    %c0_54 = arith.constant 0 : index
    %c0_55 = arith.constant 0 : index
    %88 = vector.load %arg5[%c4_53, %c0_54, %c0_55] : memref<8x8x128xf32, #tpu.memory_space<vmem>>, vector<1x8x128xf32>
    %89 = vector.shape_cast %88 : vector<1x8x128xf32> to vector<8x128xf32>
    %90 = vector.broadcast %83 : vector<1x128xf32> to vector<8x128xf32>
    %91 = arith.mulf %87, %90 : vector<8x128xf32>
    %92 = vector.broadcast %85 : vector<1x128xf32> to vector<8x128xf32>
    %93 = arith.mulf %89, %92 : vector<8x128xf32>
    %94 = arith.subf %91, %93 : vector<8x128xf32>
    %95 = arith.addf %75, %94 : vector<8x128xf32>
    %96 = vector.broadcast %85 : vector<1x128xf32> to vector<8x128xf32>
    %97 = arith.mulf %87, %96 : vector<8x128xf32>
    %98 = vector.broadcast %83 : vector<1x128xf32> to vector<8x128xf32>
    %99 = arith.mulf %89, %98 : vector<8x128xf32>
    %100 = arith.addf %97, %99 : vector<8x128xf32>
    %101 = arith.addf %81, %100 : vector<8x128xf32>
    %c0_56 = arith.constant 0 : index
    %c5 = arith.constant 5 : index
    %c0_57 = arith.constant 0 : index
    %102 = vector.load %arg2[%c0_56, %c5, %c0_57] : memref<1x8x128xf32, #tpu.memory_space<vmem>>, vector<1x1x128xf32>
    %103 = vector.shape_cast %102 : vector<1x1x128xf32> to vector<1x128xf32>
    %c0_58 = arith.constant 0 : index
    %c5_59 = arith.constant 5 : index
    %c0_60 = arith.constant 0 : index
    %104 = vector.load %arg3[%c0_58, %c5_59, %c0_60] : memref<1x8x128xf32, #tpu.memory_space<vmem>>, vector<1x1x128xf32>
    %105 = vector.shape_cast %104 : vector<1x1x128xf32> to vector<1x128xf32>
    %c5_61 = arith.constant 5 : index
    %c0_62 = arith.constant 0 : index
    %c0_63 = arith.constant 0 : index
    %106 = vector.load %arg4[%c5_61, %c0_62, %c0_63] : memref<8x8x128xf32, #tpu.memory_space<vmem>>, vector<1x8x128xf32>
    %107 = vector.shape_cast %106 : vector<1x8x128xf32> to vector<8x128xf32>
    %c5_64 = arith.constant 5 : index
    %c0_65 = arith.constant 0 : index
    %c0_66 = arith.constant 0 : index
    %108 = vector.load %arg5[%c5_64, %c0_65, %c0_66] : memref<8x8x128xf32, #tpu.memory_space<vmem>>, vector<1x8x128xf32>
    %109 = vector.shape_cast %108 : vector<1x8x128xf32> to vector<8x128xf32>
    %110 = vector.broadcast %103 : vector<1x128xf32> to vector<8x128xf32>
    %111 = arith.mulf %107, %110 : vector<8x128xf32>
    %112 = vector.broadcast %105 : vector<1x128xf32> to vector<8x128xf32>
    %113 = arith.mulf %109, %112 : vector<8x128xf32>
    %114 = arith.subf %111, %113 : vector<8x128xf32>
    %115 = arith.addf %95, %114 : vector<8x128xf32>
    %116 = vector.broadcast %105 : vector<1x128xf32> to vector<8x128xf32>
    %117 = arith.mulf %107, %116 : vector<8x128xf32>
    %118 = vector.broadcast %103 : vector<1x128xf32> to vector<8x128xf32>
    %119 = arith.mulf %109, %118 : vector<8x128xf32>
    %120 = arith.addf %117, %119 : vector<8x128xf32>
    %121 = arith.addf %101, %120 : vector<8x128xf32>
    %c0_67 = arith.constant 0 : index
    %c6 = arith.constant 6 : index
    %c0_68 = arith.constant 0 : index
    %122 = vector.load %arg2[%c0_67, %c6, %c0_68] : memref<1x8x128xf32, #tpu.memory_space<vmem>>, vector<1x1x128xf32>
    %123 = vector.shape_cast %122 : vector<1x1x128xf32> to vector<1x128xf32>
    %c0_69 = arith.constant 0 : index
    %c6_70 = arith.constant 6 : index
    %c0_71 = arith.constant 0 : index
    %124 = vector.load %arg3[%c0_69, %c6_70, %c0_71] : memref<1x8x128xf32, #tpu.memory_space<vmem>>, vector<1x1x128xf32>
    %125 = vector.shape_cast %124 : vector<1x1x128xf32> to vector<1x128xf32>
    %c6_72 = arith.constant 6 : index
    %c0_73 = arith.constant 0 : index
    %c0_74 = arith.constant 0 : index
    %126 = vector.load %arg4[%c6_72, %c0_73, %c0_74] : memref<8x8x128xf32, #tpu.memory_space<vmem>>, vector<1x8x128xf32>
    %127 = vector.shape_cast %126 : vector<1x8x128xf32> to vector<8x128xf32>
    %c6_75 = arith.constant 6 : index
    %c0_76 = arith.constant 0 : index
    %c0_77 = arith.constant 0 : index
    %128 = vector.load %arg5[%c6_75, %c0_76, %c0_77] : memref<8x8x128xf32, #tpu.memory_space<vmem>>, vector<1x8x128xf32>
    %129 = vector.shape_cast %128 : vector<1x8x128xf32> to vector<8x128xf32>
    %130 = vector.broadcast %123 : vector<1x128xf32> to vector<8x128xf32>
    %131 = arith.mulf %127, %130 : vector<8x128xf32>
    %132 = vector.broadcast %125 : vector<1x128xf32> to vector<8x128xf32>
    %133 = arith.mulf %129, %132 : vector<8x128xf32>
    %134 = arith.subf %131, %133 : vector<8x128xf32>
    %135 = arith.addf %115, %134 : vector<8x128xf32>
    %136 = vector.broadcast %125 : vector<1x128xf32> to vector<8x128xf32>
    %137 = arith.mulf %127, %136 : vector<8x128xf32>
    %138 = vector.broadcast %123 : vector<1x128xf32> to vector<8x128xf32>
    %139 = arith.mulf %129, %138 : vector<8x128xf32>
    %140 = arith.addf %137, %139 : vector<8x128xf32>
    %141 = arith.addf %121, %140 : vector<8x128xf32>
    %c0_78 = arith.constant 0 : index
    %c7 = arith.constant 7 : index
    %c0_79 = arith.constant 0 : index
    %142 = vector.load %arg2[%c0_78, %c7, %c0_79] : memref<1x8x128xf32, #tpu.memory_space<vmem>>, vector<1x1x128xf32>
    %143 = vector.shape_cast %142 : vector<1x1x128xf32> to vector<1x128xf32>
    %c0_80 = arith.constant 0 : index
    %c7_81 = arith.constant 7 : index
    %c0_82 = arith.constant 0 : index
    %144 = vector.load %arg3[%c0_80, %c7_81, %c0_82] : memref<1x8x128xf32, #tpu.memory_space<vmem>>, vector<1x1x128xf32>
    %145 = vector.shape_cast %144 : vector<1x1x128xf32> to vector<1x128xf32>
    %c7_83 = arith.constant 7 : index
    %c0_84 = arith.constant 0 : index
    %c0_85 = arith.constant 0 : index
    %146 = vector.load %arg4[%c7_83, %c0_84, %c0_85] : memref<8x8x128xf32, #tpu.memory_space<vmem>>, vector<1x8x128xf32>
    %147 = vector.shape_cast %146 : vector<1x8x128xf32> to vector<8x128xf32>
    %c7_86 = arith.constant 7 : index
    %c0_87 = arith.constant 0 : index
    %c0_88 = arith.constant 0 : index
    %148 = vector.load %arg5[%c7_86, %c0_87, %c0_88] : memref<8x8x128xf32, #tpu.memory_space<vmem>>, vector<1x8x128xf32>
    %149 = vector.shape_cast %148 : vector<1x8x128xf32> to vector<8x128xf32>
    %150 = vector.broadcast %143 : vector<1x128xf32> to vector<8x128xf32>
    %151 = arith.mulf %147, %150 : vector<8x128xf32>
    %152 = vector.broadcast %145 : vector<1x128xf32> to vector<8x128xf32>
    %153 = arith.mulf %149, %152 : vector<8x128xf32>
    %154 = arith.subf %151, %153 : vector<8x128xf32>
    %155 = arith.addf %135, %154 : vector<8x128xf32>
    %156 = vector.broadcast %145 : vector<1x128xf32> to vector<8x128xf32>
    %157 = arith.mulf %147, %156 : vector<8x128xf32>
    %158 = vector.broadcast %143 : vector<1x128xf32> to vector<8x128xf32>
    %159 = arith.mulf %149, %158 : vector<8x128xf32>
    %160 = arith.addf %157, %159 : vector<8x128xf32>
    %161 = arith.addf %141, %160 : vector<8x128xf32>
    %c0_89 = arith.constant 0 : index
    %c0_90 = arith.constant 0 : index
    %c0_91 = arith.constant 0 : index
    %162 = vector.load %arg6[%c0_89, %c0_90, %c0_91] : memref<1x8x128xf32, #tpu.memory_space<vmem>>, vector<1x8x128xf32>
    %163 = vector.shape_cast %162 : vector<1x8x128xf32> to vector<8x128xf32>
    %164 = vector.shape_cast %155 : vector<8x128xf32> to vector<1x8x128xf32>
    tpu.vector_store %arg6[%c0_89, %c0_90, %c0_91], %164 {strides = array<i32>} : memref<1x8x128xf32, #tpu.memory_space<vmem>>, vector<1x8x128xf32>,
    %c0_92 = arith.constant 0 : index
    %c0_93 = arith.constant 0 : index
    %c0_94 = arith.constant 0 : index
    %165 = vector.load %arg7[%c0_92, %c0_93, %c0_94] : memref<1x8x128xf32, #tpu.memory_space<vmem>>, vector<1x8x128xf32>
    %166 = vector.shape_cast %165 : vector<1x8x128xf32> to vector<8x128xf32>
    %167 = vector.shape_cast %161 : vector<8x128xf32> to vector<1x8x128xf32>
    tpu.vector_store %arg7[%c0_92, %c0_93, %c0_94], %167 {strides = array<i32>} : memref<1x8x128xf32, #tpu.memory_space<vmem>>, vector<1x8x128xf32>,
    return
  }
  func.func @transform_0(%arg0: i32, %arg1: i32) -> (i32, i32, i32) {
    %c0_i32 = arith.constant 0 : i32
    %c0_i32_0 = arith.constant 0 : i32
    return %arg1, %c0_i32, %arg0 : i32, i32, i32
  }
  func.func @transform_1(%arg0: i32, %arg1: i32) -> (i32, i32, i32) {
    %c0_i32 = arith.constant 0 : i32
    %c0_i32_0 = arith.constant 0 : i32
    return %arg1, %c0_i32, %arg0 : i32, i32, i32
  }
  func.func @transform_2(%arg0: i32, %arg1: i32) -> (i32, i32, i32) {
    %c0_i32 = arith.constant 0 : i32
    %c0_i32_0 = arith.constant 0 : i32
    %c0_i32_1 = arith.constant 0 : i32
    return %c0_i32, %c0_i32_0, %arg0 : i32, i32, i32
  }
  func.func @transform_3(%arg0: i32, %arg1: i32) -> (i32, i32, i32) {
    %c0_i32 = arith.constant 0 : i32
    %c0_i32_0 = arith.constant 0 : i32
    %c0_i32_1 = arith.constant 0 : i32
    return %c0_i32, %c0_i32_0, %arg0 : i32, i32, i32
  }
  func.func @transform_4(%arg0: i32, %arg1: i32) -> (i32, i32, i32) {
    %c0_i32 = arith.constant 0 : i32
    %c0_i32_0 = arith.constant 0 : i32
    return %arg1, %c0_i32, %arg0 : i32, i32, i32
  }
  func.func @transform_5(%arg0: i32, %arg1: i32) -> (i32, i32, i32) {
    %c0_i32 = arith.constant 0 : i32
    %c0_i32_0 = arith.constant 0 : i32
    return %arg1, %c0_i32, %arg0 : i32, i32, i32
  }
}

module attributes {stable_mosaic.version = 11 : i64} {
  func.func @_conv1x1_kernel(%arg0: i32, %arg1: i32, %arg2: memref<1x8x512xf32, #tpu.memory_space<vmem>>, %arg3: memref<8x8xf32, #tpu.memory_space<vmem>>, %arg4: memref<8x1xf32, #tpu.memory_space<vmem>>, %arg5: memref<1x8x512xf32, #tpu.memory_space<vmem>>, %arg6: memref<1x8x512xf32, #tpu.memory_space<vmem>>) attributes {dimension_semantics = [#tpu.dimension_semantics<parallel>, #tpu.dimension_semantics<parallel>], iteration_bounds = array<i64: 2, 1>, scalar_prefetch = 0 : i64, scratch_operands = 0 : i64, tpu.core_type = #tpu.core_type<tc>, window_params = [{transform_indices = @transform_0, window_bounds = array<i64: 1, 8, 512>}, {pipeline_mode = #tpu.pipeline_mode<synchronous>, transform_indices = @transform_1, window_bounds = array<i64: 8, 8>}, {pipeline_mode = #tpu.pipeline_mode<synchronous>, transform_indices = @transform_2, window_bounds = array<i64: 8, 1>}, {transform_indices = @transform_3, window_bounds = array<i64: 1, 8, 512>}, {transform_indices = @transform_4, window_bounds = array<i64: 1, 8, 512>}]} {
    %c0 = arith.constant 0 : index
    %c0_0 = arith.constant 0 : index
    %0 = vector.load %arg3[%c0, %c0_0] : memref<8x8xf32, #tpu.memory_space<vmem>>, vector<8x8xf32>
    %c0_1 = arith.constant 0 : index
    %c0_2 = arith.constant 0 : index
    %c0_3 = arith.constant 0 : index
    %1 = vector.load %arg2[%c0_1, %c0_2, %c0_3] : memref<1x8x512xf32, #tpu.memory_space<vmem>>, vector<1x8x512xf32>
    %2 = vector.shape_cast %1 : vector<1x8x512xf32> to vector<8x512xf32>
    %cst = arith.constant dense<0.000000e+00> : vector<8x512xf32>
    %3 = tpu.matmul %0, %2, %cst {dimension_numbers = #tpu.dot_dimension_numbers<[1], [0], [0], [1], [0, 0, 1, 1], [], []>} : vector<8x8xf32>, vector<8x512xf32>, vector<8x512xf32> -> vector<8x512xf32>
    %c0_4 = arith.constant 0 : index
    %c0_5 = arith.constant 0 : index
    %4 = vector.load %arg4[%c0_4, %c0_5] : memref<8x1xf32, #tpu.memory_space<vmem>>, vector<8x1xf32>
    %5 = vector.broadcast %4 : vector<8x1xf32> to vector<8x512xf32>
    %6 = arith.addf %3, %5 : vector<8x512xf32>
    %c0_6 = arith.constant 0 : index
    %c0_7 = arith.constant 0 : index
    %c0_8 = arith.constant 0 : index
    %7 = vector.load %arg5[%c0_6, %c0_7, %c0_8] : memref<1x8x512xf32, #tpu.memory_space<vmem>>, vector<1x8x512xf32>
    %8 = vector.shape_cast %7 : vector<1x8x512xf32> to vector<8x512xf32>
    %9 = arith.addf %6, %8 : vector<8x512xf32>
    %cst_9 = arith.constant 0.707106769 : f32
    %10 = vector.broadcast %cst_9 : f32 to vector<8x512xf32>
    %11 = arith.mulf %9, %10 : vector<8x512xf32>
    %cst_10 = arith.constant 0.000000e+00 : f32
    %12 = vector.broadcast %cst_10 : f32 to vector<8x512xf32>
    %13 = arith.cmpf oge, %11, %12 : vector<8x512xf32>
    %cst_11 = arith.constant 1.000000e+00 : f32
    %cst_12 = arith.constant -1.000000e+00 : f32
    %14 = vector.broadcast %cst_11 : f32 to vector<8x512xf32>
    %15 = vector.broadcast %cst_12 : f32 to vector<8x512xf32>
    %16 = arith.select %13, %14, %15 : vector<8x512xi1>, vector<8x512xf32>
    %17 = math.absf %11 : vector<8x512xf32>
    %cst_13 = arith.constant 0.327591091 : f32
    %18 = vector.broadcast %cst_13 : f32 to vector<8x512xf32>
    %19 = arith.mulf %18, %17 : vector<8x512xf32>
    %cst_14 = arith.constant 1.000000e+00 : f32
    %20 = vector.broadcast %cst_14 : f32 to vector<8x512xf32>
    %21 = arith.addf %20, %19 : vector<8x512xf32>
    %cst_15 = arith.constant 1.000000e+00 : f32
    %22 = vector.broadcast %cst_15 : f32 to vector<8x512xf32>
    %23 = arith.divf %22, %21 : vector<8x512xf32>
    %cst_16 = arith.constant 1.06140542 : f32
    %24 = vector.broadcast %cst_16 : f32 to vector<8x512xf32>
    %25 = arith.mulf %24, %23 : vector<8x512xf32>
    %cst_17 = arith.constant 1.45315206 : f32
    %26 = vector.broadcast %cst_17 : f32 to vector<8x512xf32>
    %27 = arith.subf %25, %26 : vector<8x512xf32>
    %28 = arith.mulf %27, %23 : vector<8x512xf32>
    %cst_18 = arith.constant 1.42141378 : f32
    %29 = vector.broadcast %cst_18 : f32 to vector<8x512xf32>
    %30 = arith.addf %28, %29 : vector<8x512xf32>
    %31 = arith.mulf %30, %23 : vector<8x512xf32>
    %cst_19 = arith.constant 0.284496725 : f32
    %32 = vector.broadcast %cst_19 : f32 to vector<8x512xf32>
    %33 = arith.subf %31, %32 : vector<8x512xf32>
    %34 = arith.mulf %33, %23 : vector<8x512xf32>
    %cst_20 = arith.constant 0.254829586 : f32
    %35 = vector.broadcast %cst_20 : f32 to vector<8x512xf32>
    %36 = arith.addf %34, %35 : vector<8x512xf32>
    %37 = arith.mulf %36, %23 : vector<8x512xf32>
    %cst_21 = arith.constant 0.000000e+00 : f32
    %38 = vector.broadcast %cst_21 : f32 to vector<8x512xf32>
    %39 = arith.subf %38, %17 : vector<8x512xf32>
    %40 = arith.mulf %39, %17 : vector<8x512xf32>
    %41 = math.exp %40 : vector<8x512xf32>
    %42 = arith.mulf %37, %41 : vector<8x512xf32>
    %cst_22 = arith.constant 1.000000e+00 : f32
    %43 = vector.broadcast %cst_22 : f32 to vector<8x512xf32>
    %44 = arith.subf %43, %42 : vector<8x512xf32>
    %45 = arith.mulf %16, %44 : vector<8x512xf32>
    %cst_23 = arith.constant 5.000000e-01 : f32
    %46 = vector.broadcast %cst_23 : f32 to vector<8x512xf32>
    %47 = arith.mulf %46, %9 : vector<8x512xf32>
    %cst_24 = arith.constant 1.000000e+00 : f32
    %48 = vector.broadcast %cst_24 : f32 to vector<8x512xf32>
    %49 = arith.addf %48, %45 : vector<8x512xf32>
    %50 = arith.mulf %47, %49 : vector<8x512xf32>
    %c0_25 = arith.constant 0 : index
    %c0_26 = arith.constant 0 : index
    %c0_27 = arith.constant 0 : index
    %51 = vector.load %arg6[%c0_25, %c0_26, %c0_27] : memref<1x8x512xf32, #tpu.memory_space<vmem>>, vector<1x8x512xf32>
    %52 = vector.shape_cast %51 : vector<1x8x512xf32> to vector<8x512xf32>
    %53 = vector.shape_cast %50 : vector<8x512xf32> to vector<1x8x512xf32>
    tpu.vector_store %arg6[%c0_25, %c0_26, %c0_27], %53 {strides = array<i32>} : memref<1x8x512xf32, #tpu.memory_space<vmem>>, vector<1x8x512xf32>,
    return
  }
  func.func @transform_0(%arg0: i32, %arg1: i32) -> (i32, i32, i32) {
    %c0_i32 = arith.constant 0 : i32
    %c0_i32_0 = arith.constant 0 : i32
    return %arg0, %c0_i32, %arg1 : i32, i32, i32
  }
  func.func @transform_1(%arg0: i32, %arg1: i32) -> (i32, i32) {
    %c0_i32 = arith.constant 0 : i32
    %c0_i32_0 = arith.constant 0 : i32
    %c0_i32_1 = arith.constant 0 : i32
    return %c0_i32, %c0_i32_0 : i32, i32
  }
  func.func @transform_2(%arg0: i32, %arg1: i32) -> (i32, i32) {
    %c0_i32 = arith.constant 0 : i32
    %c0_i32_0 = arith.constant 0 : i32
    %c0_i32_1 = arith.constant 0 : i32
    return %c0_i32, %c0_i32_0 : i32, i32
  }
  func.func @transform_3(%arg0: i32, %arg1: i32) -> (i32, i32, i32) {
    %c0_i32 = arith.constant 0 : i32
    %c0_i32_0 = arith.constant 0 : i32
    return %arg0, %c0_i32, %arg1 : i32, i32, i32
  }
  func.func @transform_4(%arg0: i32, %arg1: i32) -> (i32, i32, i32) {
    %c0_i32 = arith.constant 0 : i32
    %c0_i32_0 = arith.constant 0 : i32
    return %arg0, %c0_i32, %arg1 : i32, i32, i32
  }
}

module attributes {stable_mosaic.version = 11 : i64} {
  func.func @_conv1x1_kernel(%arg0: i32, %arg1: i32, %arg2: memref<1x8x512xf32, #tpu.memory_space<vmem>>, %arg3: memref<8x8xf32, #tpu.memory_space<vmem>>, %arg4: memref<8x1xf32, #tpu.memory_space<vmem>>, %arg5: memref<1x8x512xf32, #tpu.memory_space<vmem>>, %arg6: memref<1x8x512xf32, #tpu.memory_space<vmem>>) attributes {dimension_semantics = [#tpu.dimension_semantics<parallel>, #tpu.dimension_semantics<parallel>], iteration_bounds = array<i64: 2, 1>, scalar_prefetch = 0 : i64, scratch_operands = 0 : i64, tpu.core_type = #tpu.core_type<tc>, window_params = [{transform_indices = @transform_0, window_bounds = array<i64: 1, 8, 512>}, {pipeline_mode = #tpu.pipeline_mode<synchronous>, transform_indices = @transform_1, window_bounds = array<i64: 8, 8>}, {pipeline_mode = #tpu.pipeline_mode<synchronous>, transform_indices = @transform_2, window_bounds = array<i64: 8, 1>}, {transform_indices = @transform_3, window_bounds = array<i64: 1, 8, 512>}, {transform_indices = @transform_4, window_bounds = array<i64: 1, 8, 512>}]} {
    %c0 = arith.constant 0 : index
    %c0_0 = arith.constant 0 : index
    %0 = vector.load %arg3[%c0, %c0_0] : memref<8x8xf32, #tpu.memory_space<vmem>>, vector<8x8xf32>
    %c0_1 = arith.constant 0 : index
    %c0_2 = arith.constant 0 : index
    %c0_3 = arith.constant 0 : index
    %1 = vector.load %arg2[%c0_1, %c0_2, %c0_3] : memref<1x8x512xf32, #tpu.memory_space<vmem>>, vector<1x8x512xf32>
    %2 = vector.shape_cast %1 : vector<1x8x512xf32> to vector<8x512xf32>
    %cst = arith.constant dense<0.000000e+00> : vector<8x512xf32>
    %3 = tpu.matmul %0, %2, %cst {dimension_numbers = #tpu.dot_dimension_numbers<[1], [0], [0], [1], [0, 0, 1, 1], [], []>} : vector<8x8xf32>, vector<8x512xf32>, vector<8x512xf32> -> vector<8x512xf32>
    %c0_4 = arith.constant 0 : index
    %c0_5 = arith.constant 0 : index
    %4 = vector.load %arg4[%c0_4, %c0_5] : memref<8x1xf32, #tpu.memory_space<vmem>>, vector<8x1xf32>
    %5 = vector.broadcast %4 : vector<8x1xf32> to vector<8x512xf32>
    %6 = arith.addf %3, %5 : vector<8x512xf32>
    %c0_6 = arith.constant 0 : index
    %c0_7 = arith.constant 0 : index
    %c0_8 = arith.constant 0 : index
    %7 = vector.load %arg5[%c0_6, %c0_7, %c0_8] : memref<1x8x512xf32, #tpu.memory_space<vmem>>, vector<1x8x512xf32>
    %8 = vector.shape_cast %7 : vector<1x8x512xf32> to vector<8x512xf32>
    %9 = arith.addf %6, %8 : vector<8x512xf32>
    %c0_9 = arith.constant 0 : index
    %c0_10 = arith.constant 0 : index
    %c0_11 = arith.constant 0 : index
    %10 = vector.load %arg6[%c0_9, %c0_10, %c0_11] : memref<1x8x512xf32, #tpu.memory_space<vmem>>, vector<1x8x512xf32>
    %11 = vector.shape_cast %10 : vector<1x8x512xf32> to vector<8x512xf32>
    %12 = vector.shape_cast %9 : vector<8x512xf32> to vector<1x8x512xf32>
    tpu.vector_store %arg6[%c0_9, %c0_10, %c0_11], %12 {strides = array<i32>} : memref<1x8x512xf32, #tpu.memory_space<vmem>>, vector<1x8x512xf32>,
    return
  }
  func.func @transform_0(%arg0: i32, %arg1: i32) -> (i32, i32, i32) {
    %c0_i32 = arith.constant 0 : i32
    %c0_i32_0 = arith.constant 0 : i32
    return %arg0, %c0_i32, %arg1 : i32, i32, i32
  }
  func.func @transform_1(%arg0: i32, %arg1: i32) -> (i32, i32) {
    %c0_i32 = arith.constant 0 : i32
    %c0_i32_0 = arith.constant 0 : i32
    %c0_i32_1 = arith.constant 0 : i32
    return %c0_i32, %c0_i32_0 : i32, i32
  }
  func.func @transform_2(%arg0: i32, %arg1: i32) -> (i32, i32) {
    %c0_i32 = arith.constant 0 : i32
    %c0_i32_0 = arith.constant 0 : i32
    %c0_i32_1 = arith.constant 0 : i32
    return %c0_i32, %c0_i32_0 : i32, i32
  }
  func.func @transform_3(%arg0: i32, %arg1: i32) -> (i32, i32, i32) {
    %c0_i32 = arith.constant 0 : i32
    %c0_i32_0 = arith.constant 0 : i32
    return %arg0, %c0_i32, %arg1 : i32, i32, i32
  }
  func.func @transform_4(%arg0: i32, %arg1: i32) -> (i32, i32, i32) {
    %c0_i32 = arith.constant 0 : i32
    %c0_i32_0 = arith.constant 0 : i32
    return %arg0, %c0_i32, %arg1 : i32, i32, i32
  }
}

module attributes {stable_mosaic.version = 11 : i64} {
  func.func @_conv1x1_kernel(%arg0: i32, %arg1: i32, %arg2: memref<1x8x512xf32, #tpu.memory_space<vmem>>, %arg3: memref<8x8xf32, #tpu.memory_space<vmem>>, %arg4: memref<8x1xf32, #tpu.memory_space<vmem>>, %arg5: memref<1x8x512xf32, #tpu.memory_space<vmem>>) attributes {dimension_semantics = [#tpu.dimension_semantics<parallel>, #tpu.dimension_semantics<parallel>], iteration_bounds = array<i64: 2, 1>, scalar_prefetch = 0 : i64, scratch_operands = 0 : i64, tpu.core_type = #tpu.core_type<tc>, window_params = [{transform_indices = @transform_0, window_bounds = array<i64: 1, 8, 512>}, {pipeline_mode = #tpu.pipeline_mode<synchronous>, transform_indices = @transform_1, window_bounds = array<i64: 8, 8>}, {pipeline_mode = #tpu.pipeline_mode<synchronous>, transform_indices = @transform_2, window_bounds = array<i64: 8, 1>}, {transform_indices = @transform_3, window_bounds = array<i64: 1, 8, 512>}]} {
    %c0 = arith.constant 0 : index
    %c0_0 = arith.constant 0 : index
    %0 = vector.load %arg3[%c0, %c0_0] : memref<8x8xf32, #tpu.memory_space<vmem>>, vector<8x8xf32>
    %c0_1 = arith.constant 0 : index
    %c0_2 = arith.constant 0 : index
    %c0_3 = arith.constant 0 : index
    %1 = vector.load %arg2[%c0_1, %c0_2, %c0_3] : memref<1x8x512xf32, #tpu.memory_space<vmem>>, vector<1x8x512xf32>
    %2 = vector.shape_cast %1 : vector<1x8x512xf32> to vector<8x512xf32>
    %cst = arith.constant dense<0.000000e+00> : vector<8x512xf32>
    %3 = tpu.matmul %0, %2, %cst {dimension_numbers = #tpu.dot_dimension_numbers<[1], [0], [0], [1], [0, 0, 1, 1], [], []>} : vector<8x8xf32>, vector<8x512xf32>, vector<8x512xf32> -> vector<8x512xf32>
    %c0_4 = arith.constant 0 : index
    %c0_5 = arith.constant 0 : index
    %4 = vector.load %arg4[%c0_4, %c0_5] : memref<8x1xf32, #tpu.memory_space<vmem>>, vector<8x1xf32>
    %5 = vector.broadcast %4 : vector<8x1xf32> to vector<8x512xf32>
    %6 = arith.addf %3, %5 : vector<8x512xf32>
    %c0_6 = arith.constant 0 : index
    %c0_7 = arith.constant 0 : index
    %c0_8 = arith.constant 0 : index
    %7 = vector.load %arg5[%c0_6, %c0_7, %c0_8] : memref<1x8x512xf32, #tpu.memory_space<vmem>>, vector<1x8x512xf32>
    %8 = vector.shape_cast %7 : vector<1x8x512xf32> to vector<8x512xf32>
    %9 = vector.shape_cast %6 : vector<8x512xf32> to vector<1x8x512xf32>
    tpu.vector_store %arg5[%c0_6, %c0_7, %c0_8], %9 {strides = array<i32>} : memref<1x8x512xf32, #tpu.memory_space<vmem>>, vector<1x8x512xf32>,
    return
  }
  func.func @transform_0(%arg0: i32, %arg1: i32) -> (i32, i32, i32) {
    %c0_i32 = arith.constant 0 : i32
    %c0_i32_0 = arith.constant 0 : i32
    return %arg0, %c0_i32, %arg1 : i32, i32, i32
  }
  func.func @transform_1(%arg0: i32, %arg1: i32) -> (i32, i32) {
    %c0_i32 = arith.constant 0 : i32
    %c0_i32_0 = arith.constant 0 : i32
    %c0_i32_1 = arith.constant 0 : i32
    return %c0_i32, %c0_i32_0 : i32, i32
  }
  func.func @transform_2(%arg0: i32, %arg1: i32) -> (i32, i32) {
    %c0_i32 = arith.constant 0 : i32
    %c0_i32_0 = arith.constant 0 : i32
    %c0_i32_1 = arith.constant 0 : i32
    return %c0_i32, %c0_i32_0 : i32, i32
  }
  func.func @transform_3(%arg0: i32, %arg1: i32) -> (i32, i32, i32) {
    %c0_i32 = arith.constant 0 : i32
    %c0_i32_0 = arith.constant 0 : i32
    return %arg0, %c0_i32, %arg1 : i32, i32, i32
  }
}

module attributes {stable_mosaic.version = 11 : i64} {
  func.func @_spectral_kernel(%arg0: i32, %arg1: i32, %arg2: memref<1x8x128xf32, #tpu.memory_space<vmem>>, %arg3: memref<1x8x128xf32, #tpu.memory_space<vmem>>, %arg4: memref<8x4x128xf32, #tpu.memory_space<vmem>>, %arg5: memref<8x4x128xf32, #tpu.memory_space<vmem>>, %arg6: memref<1x4x128xf32, #tpu.memory_space<vmem>>, %arg7: memref<1x4x128xf32, #tpu.memory_space<vmem>>) attributes {dimension_semantics = [#tpu.dimension_semantics<parallel>, #tpu.dimension_semantics<parallel>], iteration_bounds = array<i64: 1, 2>, scalar_prefetch = 0 : i64, scratch_operands = 0 : i64, tpu.core_type = #tpu.core_type<tc>, window_params = [{transform_indices = @transform_0, window_bounds = array<i64: 1, 8, 128>}, {transform_indices = @transform_1, window_bounds = array<i64: 1, 8, 128>}, {transform_indices = @transform_2, window_bounds = array<i64: 8, 4, 128>}, {transform_indices = @transform_3, window_bounds = array<i64: 8, 4, 128>}, {transform_indices = @transform_4, window_bounds = array<i64: 1, 4, 128>}, {transform_indices = @transform_5, window_bounds = array<i64: 1, 4, 128>}]} {
    %cst = arith.constant 0.000000e+00 : f32
    %0 = vector.broadcast %cst : f32 to vector<4x128xf32>
    %cst_0 = arith.constant 0.000000e+00 : f32
    %1 = vector.broadcast %cst_0 : f32 to vector<4x128xf32>
    %c0 = arith.constant 0 : index
    %c0_1 = arith.constant 0 : index
    %c0_2 = arith.constant 0 : index
    %2 = vector.load %arg2[%c0, %c0_1, %c0_2] : memref<1x8x128xf32, #tpu.memory_space<vmem>>, vector<1x1x128xf32>
    %3 = vector.shape_cast %2 : vector<1x1x128xf32> to vector<1x128xf32>
    %c0_3 = arith.constant 0 : index
    %c0_4 = arith.constant 0 : index
    %c0_5 = arith.constant 0 : index
    %4 = vector.load %arg3[%c0_3, %c0_4, %c0_5] : memref<1x8x128xf32, #tpu.memory_space<vmem>>, vector<1x1x128xf32>
    %5 = vector.shape_cast %4 : vector<1x1x128xf32> to vector<1x128xf32>
    %c0_6 = arith.constant 0 : index
    %c0_7 = arith.constant 0 : index
    %c0_8 = arith.constant 0 : index
    %6 = vector.load %arg4[%c0_6, %c0_7, %c0_8] : memref<8x4x128xf32, #tpu.memory_space<vmem>>, vector<1x4x128xf32>
    %7 = vector.shape_cast %6 : vector<1x4x128xf32> to vector<4x128xf32>
    %c0_9 = arith.constant 0 : index
    %c0_10 = arith.constant 0 : index
    %c0_11 = arith.constant 0 : index
    %8 = vector.load %arg5[%c0_9, %c0_10, %c0_11] : memref<8x4x128xf32, #tpu.memory_space<vmem>>, vector<1x4x128xf32>
    %9 = vector.shape_cast %8 : vector<1x4x128xf32> to vector<4x128xf32>
    %10 = vector.broadcast %3 : vector<1x128xf32> to vector<4x128xf32>
    %11 = arith.mulf %7, %10 : vector<4x128xf32>
    %12 = vector.broadcast %5 : vector<1x128xf32> to vector<4x128xf32>
    %13 = arith.mulf %9, %12 : vector<4x128xf32>
    %14 = arith.subf %11, %13 : vector<4x128xf32>
    %15 = arith.addf %0, %14 : vector<4x128xf32>
    %16 = vector.broadcast %5 : vector<1x128xf32> to vector<4x128xf32>
    %17 = arith.mulf %7, %16 : vector<4x128xf32>
    %18 = vector.broadcast %3 : vector<1x128xf32> to vector<4x128xf32>
    %19 = arith.mulf %9, %18 : vector<4x128xf32>
    %20 = arith.addf %17, %19 : vector<4x128xf32>
    %21 = arith.addf %1, %20 : vector<4x128xf32>
    %c0_12 = arith.constant 0 : index
    %c1 = arith.constant 1 : index
    %c0_13 = arith.constant 0 : index
    %22 = vector.load %arg2[%c0_12, %c1, %c0_13] : memref<1x8x128xf32, #tpu.memory_space<vmem>>, vector<1x1x128xf32>
    %23 = vector.shape_cast %22 : vector<1x1x128xf32> to vector<1x128xf32>
    %c0_14 = arith.constant 0 : index
    %c1_15 = arith.constant 1 : index
    %c0_16 = arith.constant 0 : index
    %24 = vector.load %arg3[%c0_14, %c1_15, %c0_16] : memref<1x8x128xf32, #tpu.memory_space<vmem>>, vector<1x1x128xf32>
    %25 = vector.shape_cast %24 : vector<1x1x128xf32> to vector<1x128xf32>
    %c1_17 = arith.constant 1 : index
    %c0_18 = arith.constant 0 : index
    %c0_19 = arith.constant 0 : index
    %26 = vector.load %arg4[%c1_17, %c0_18, %c0_19] : memref<8x4x128xf32, #tpu.memory_space<vmem>>, vector<1x4x128xf32>
    %27 = vector.shape_cast %26 : vector<1x4x128xf32> to vector<4x128xf32>
    %c1_20 = arith.constant 1 : index
    %c0_21 = arith.constant 0 : index
    %c0_22 = arith.constant 0 : index
    %28 = vector.load %arg5[%c1_20, %c0_21, %c0_22] : memref<8x4x128xf32, #tpu.memory_space<vmem>>, vector<1x4x128xf32>
    %29 = vector.shape_cast %28 : vector<1x4x128xf32> to vector<4x128xf32>
    %30 = vector.broadcast %23 : vector<1x128xf32> to vector<4x128xf32>
    %31 = arith.mulf %27, %30 : vector<4x128xf32>
    %32 = vector.broadcast %25 : vector<1x128xf32> to vector<4x128xf32>
    %33 = arith.mulf %29, %32 : vector<4x128xf32>
    %34 = arith.subf %31, %33 : vector<4x128xf32>
    %35 = arith.addf %15, %34 : vector<4x128xf32>
    %36 = vector.broadcast %25 : vector<1x128xf32> to vector<4x128xf32>
    %37 = arith.mulf %27, %36 : vector<4x128xf32>
    %38 = vector.broadcast %23 : vector<1x128xf32> to vector<4x128xf32>
    %39 = arith.mulf %29, %38 : vector<4x128xf32>
    %40 = arith.addf %37, %39 : vector<4x128xf32>
    %41 = arith.addf %21, %40 : vector<4x128xf32>
    %c0_23 = arith.constant 0 : index
    %c2 = arith.constant 2 : index
    %c0_24 = arith.constant 0 : index
    %42 = vector.load %arg2[%c0_23, %c2, %c0_24] : memref<1x8x128xf32, #tpu.memory_space<vmem>>, vector<1x1x128xf32>
    %43 = vector.shape_cast %42 : vector<1x1x128xf32> to vector<1x128xf32>
    %c0_25 = arith.constant 0 : index
    %c2_26 = arith.constant 2 : index
    %c0_27 = arith.constant 0 : index
    %44 = vector.load %arg3[%c0_25, %c2_26, %c0_27] : memref<1x8x128xf32, #tpu.memory_space<vmem>>, vector<1x1x128xf32>
    %45 = vector.shape_cast %44 : vector<1x1x128xf32> to vector<1x128xf32>
    %c2_28 = arith.constant 2 : index
    %c0_29 = arith.constant 0 : index
    %c0_30 = arith.constant 0 : index
    %46 = vector.load %arg4[%c2_28, %c0_29, %c0_30] : memref<8x4x128xf32, #tpu.memory_space<vmem>>, vector<1x4x128xf32>
    %47 = vector.shape_cast %46 : vector<1x4x128xf32> to vector<4x128xf32>
    %c2_31 = arith.constant 2 : index
    %c0_32 = arith.constant 0 : index
    %c0_33 = arith.constant 0 : index
    %48 = vector.load %arg5[%c2_31, %c0_32, %c0_33] : memref<8x4x128xf32, #tpu.memory_space<vmem>>, vector<1x4x128xf32>
    %49 = vector.shape_cast %48 : vector<1x4x128xf32> to vector<4x128xf32>
    %50 = vector.broadcast %43 : vector<1x128xf32> to vector<4x128xf32>
    %51 = arith.mulf %47, %50 : vector<4x128xf32>
    %52 = vector.broadcast %45 : vector<1x128xf32> to vector<4x128xf32>
    %53 = arith.mulf %49, %52 : vector<4x128xf32>
    %54 = arith.subf %51, %53 : vector<4x128xf32>
    %55 = arith.addf %35, %54 : vector<4x128xf32>
    %56 = vector.broadcast %45 : vector<1x128xf32> to vector<4x128xf32>
    %57 = arith.mulf %47, %56 : vector<4x128xf32>
    %58 = vector.broadcast %43 : vector<1x128xf32> to vector<4x128xf32>
    %59 = arith.mulf %49, %58 : vector<4x128xf32>
    %60 = arith.addf %57, %59 : vector<4x128xf32>
    %61 = arith.addf %41, %60 : vector<4x128xf32>
    %c0_34 = arith.constant 0 : index
    %c3 = arith.constant 3 : index
    %c0_35 = arith.constant 0 : index
    %62 = vector.load %arg2[%c0_34, %c3, %c0_35] : memref<1x8x128xf32, #tpu.memory_space<vmem>>, vector<1x1x128xf32>
    %63 = vector.shape_cast %62 : vector<1x1x128xf32> to vector<1x128xf32>
    %c0_36 = arith.constant 0 : index
    %c3_37 = arith.constant 3 : index
    %c0_38 = arith.constant 0 : index
    %64 = vector.load %arg3[%c0_36, %c3_37, %c0_38] : memref<1x8x128xf32, #tpu.memory_space<vmem>>, vector<1x1x128xf32>
    %65 = vector.shape_cast %64 : vector<1x1x128xf32> to vector<1x128xf32>
    %c3_39 = arith.constant 3 : index
    %c0_40 = arith.constant 0 : index
    %c0_41 = arith.constant 0 : index
    %66 = vector.load %arg4[%c3_39, %c0_40, %c0_41] : memref<8x4x128xf32, #tpu.memory_space<vmem>>, vector<1x4x128xf32>
    %67 = vector.shape_cast %66 : vector<1x4x128xf32> to vector<4x128xf32>
    %c3_42 = arith.constant 3 : index
    %c0_43 = arith.constant 0 : index
    %c0_44 = arith.constant 0 : index
    %68 = vector.load %arg5[%c3_42, %c0_43, %c0_44] : memref<8x4x128xf32, #tpu.memory_space<vmem>>, vector<1x4x128xf32>
    %69 = vector.shape_cast %68 : vector<1x4x128xf32> to vector<4x128xf32>
    %70 = vector.broadcast %63 : vector<1x128xf32> to vector<4x128xf32>
    %71 = arith.mulf %67, %70 : vector<4x128xf32>
    %72 = vector.broadcast %65 : vector<1x128xf32> to vector<4x128xf32>
    %73 = arith.mulf %69, %72 : vector<4x128xf32>
    %74 = arith.subf %71, %73 : vector<4x128xf32>
    %75 = arith.addf %55, %74 : vector<4x128xf32>
    %76 = vector.broadcast %65 : vector<1x128xf32> to vector<4x128xf32>
    %77 = arith.mulf %67, %76 : vector<4x128xf32>
    %78 = vector.broadcast %63 : vector<1x128xf32> to vector<4x128xf32>
    %79 = arith.mulf %69, %78 : vector<4x128xf32>
    %80 = arith.addf %77, %79 : vector<4x128xf32>
    %81 = arith.addf %61, %80 : vector<4x128xf32>
    %c0_45 = arith.constant 0 : index
    %c4 = arith.constant 4 : index
    %c0_46 = arith.constant 0 : index
    %82 = vector.load %arg2[%c0_45, %c4, %c0_46] : memref<1x8x128xf32, #tpu.memory_space<vmem>>, vector<1x1x128xf32>
    %83 = vector.shape_cast %82 : vector<1x1x128xf32> to vector<1x128xf32>
    %c0_47 = arith.constant 0 : index
    %c4_48 = arith.constant 4 : index
    %c0_49 = arith.constant 0 : index
    %84 = vector.load %arg3[%c0_47, %c4_48, %c0_49] : memref<1x8x128xf32, #tpu.memory_space<vmem>>, vector<1x1x128xf32>
    %85 = vector.shape_cast %84 : vector<1x1x128xf32> to vector<1x128xf32>
    %c4_50 = arith.constant 4 : index
    %c0_51 = arith.constant 0 : index
    %c0_52 = arith.constant 0 : index
    %86 = vector.load %arg4[%c4_50, %c0_51, %c0_52] : memref<8x4x128xf32, #tpu.memory_space<vmem>>, vector<1x4x128xf32>
    %87 = vector.shape_cast %86 : vector<1x4x128xf32> to vector<4x128xf32>
    %c4_53 = arith.constant 4 : index
    %c0_54 = arith.constant 0 : index
    %c0_55 = arith.constant 0 : index
    %88 = vector.load %arg5[%c4_53, %c0_54, %c0_55] : memref<8x4x128xf32, #tpu.memory_space<vmem>>, vector<1x4x128xf32>
    %89 = vector.shape_cast %88 : vector<1x4x128xf32> to vector<4x128xf32>
    %90 = vector.broadcast %83 : vector<1x128xf32> to vector<4x128xf32>
    %91 = arith.mulf %87, %90 : vector<4x128xf32>
    %92 = vector.broadcast %85 : vector<1x128xf32> to vector<4x128xf32>
    %93 = arith.mulf %89, %92 : vector<4x128xf32>
    %94 = arith.subf %91, %93 : vector<4x128xf32>
    %95 = arith.addf %75, %94 : vector<4x128xf32>
    %96 = vector.broadcast %85 : vector<1x128xf32> to vector<4x128xf32>
    %97 = arith.mulf %87, %96 : vector<4x128xf32>
    %98 = vector.broadcast %83 : vector<1x128xf32> to vector<4x128xf32>
    %99 = arith.mulf %89, %98 : vector<4x128xf32>
    %100 = arith.addf %97, %99 : vector<4x128xf32>
    %101 = arith.addf %81, %100 : vector<4x128xf32>
    %c0_56 = arith.constant 0 : index
    %c5 = arith.constant 5 : index
    %c0_57 = arith.constant 0 : index
    %102 = vector.load %arg2[%c0_56, %c5, %c0_57] : memref<1x8x128xf32, #tpu.memory_space<vmem>>, vector<1x1x128xf32>
    %103 = vector.shape_cast %102 : vector<1x1x128xf32> to vector<1x128xf32>
    %c0_58 = arith.constant 0 : index
    %c5_59 = arith.constant 5 : index
    %c0_60 = arith.constant 0 : index
    %104 = vector.load %arg3[%c0_58, %c5_59, %c0_60] : memref<1x8x128xf32, #tpu.memory_space<vmem>>, vector<1x1x128xf32>
    %105 = vector.shape_cast %104 : vector<1x1x128xf32> to vector<1x128xf32>
    %c5_61 = arith.constant 5 : index
    %c0_62 = arith.constant 0 : index
    %c0_63 = arith.constant 0 : index
    %106 = vector.load %arg4[%c5_61, %c0_62, %c0_63] : memref<8x4x128xf32, #tpu.memory_space<vmem>>, vector<1x4x128xf32>
    %107 = vector.shape_cast %106 : vector<1x4x128xf32> to vector<4x128xf32>
    %c5_64 = arith.constant 5 : index
    %c0_65 = arith.constant 0 : index
    %c0_66 = arith.constant 0 : index
    %108 = vector.load %arg5[%c5_64, %c0_65, %c0_66] : memref<8x4x128xf32, #tpu.memory_space<vmem>>, vector<1x4x128xf32>
    %109 = vector.shape_cast %108 : vector<1x4x128xf32> to vector<4x128xf32>
    %110 = vector.broadcast %103 : vector<1x128xf32> to vector<4x128xf32>
    %111 = arith.mulf %107, %110 : vector<4x128xf32>
    %112 = vector.broadcast %105 : vector<1x128xf32> to vector<4x128xf32>
    %113 = arith.mulf %109, %112 : vector<4x128xf32>
    %114 = arith.subf %111, %113 : vector<4x128xf32>
    %115 = arith.addf %95, %114 : vector<4x128xf32>
    %116 = vector.broadcast %105 : vector<1x128xf32> to vector<4x128xf32>
    %117 = arith.mulf %107, %116 : vector<4x128xf32>
    %118 = vector.broadcast %103 : vector<1x128xf32> to vector<4x128xf32>
    %119 = arith.mulf %109, %118 : vector<4x128xf32>
    %120 = arith.addf %117, %119 : vector<4x128xf32>
    %121 = arith.addf %101, %120 : vector<4x128xf32>
    %c0_67 = arith.constant 0 : index
    %c6 = arith.constant 6 : index
    %c0_68 = arith.constant 0 : index
    %122 = vector.load %arg2[%c0_67, %c6, %c0_68] : memref<1x8x128xf32, #tpu.memory_space<vmem>>, vector<1x1x128xf32>
    %123 = vector.shape_cast %122 : vector<1x1x128xf32> to vector<1x128xf32>
    %c0_69 = arith.constant 0 : index
    %c6_70 = arith.constant 6 : index
    %c0_71 = arith.constant 0 : index
    %124 = vector.load %arg3[%c0_69, %c6_70, %c0_71] : memref<1x8x128xf32, #tpu.memory_space<vmem>>, vector<1x1x128xf32>
    %125 = vector.shape_cast %124 : vector<1x1x128xf32> to vector<1x128xf32>
    %c6_72 = arith.constant 6 : index
    %c0_73 = arith.constant 0 : index
    %c0_74 = arith.constant 0 : index
    %126 = vector.load %arg4[%c6_72, %c0_73, %c0_74] : memref<8x4x128xf32, #tpu.memory_space<vmem>>, vector<1x4x128xf32>
    %127 = vector.shape_cast %126 : vector<1x4x128xf32> to vector<4x128xf32>
    %c6_75 = arith.constant 6 : index
    %c0_76 = arith.constant 0 : index
    %c0_77 = arith.constant 0 : index
    %128 = vector.load %arg5[%c6_75, %c0_76, %c0_77] : memref<8x4x128xf32, #tpu.memory_space<vmem>>, vector<1x4x128xf32>
    %129 = vector.shape_cast %128 : vector<1x4x128xf32> to vector<4x128xf32>
    %130 = vector.broadcast %123 : vector<1x128xf32> to vector<4x128xf32>
    %131 = arith.mulf %127, %130 : vector<4x128xf32>
    %132 = vector.broadcast %125 : vector<1x128xf32> to vector<4x128xf32>
    %133 = arith.mulf %129, %132 : vector<4x128xf32>
    %134 = arith.subf %131, %133 : vector<4x128xf32>
    %135 = arith.addf %115, %134 : vector<4x128xf32>
    %136 = vector.broadcast %125 : vector<1x128xf32> to vector<4x128xf32>
    %137 = arith.mulf %127, %136 : vector<4x128xf32>
    %138 = vector.broadcast %123 : vector<1x128xf32> to vector<4x128xf32>
    %139 = arith.mulf %129, %138 : vector<4x128xf32>
    %140 = arith.addf %137, %139 : vector<4x128xf32>
    %141 = arith.addf %121, %140 : vector<4x128xf32>
    %c0_78 = arith.constant 0 : index
    %c7 = arith.constant 7 : index
    %c0_79 = arith.constant 0 : index
    %142 = vector.load %arg2[%c0_78, %c7, %c0_79] : memref<1x8x128xf32, #tpu.memory_space<vmem>>, vector<1x1x128xf32>
    %143 = vector.shape_cast %142 : vector<1x1x128xf32> to vector<1x128xf32>
    %c0_80 = arith.constant 0 : index
    %c7_81 = arith.constant 7 : index
    %c0_82 = arith.constant 0 : index
    %144 = vector.load %arg3[%c0_80, %c7_81, %c0_82] : memref<1x8x128xf32, #tpu.memory_space<vmem>>, vector<1x1x128xf32>
    %145 = vector.shape_cast %144 : vector<1x1x128xf32> to vector<1x128xf32>
    %c7_83 = arith.constant 7 : index
    %c0_84 = arith.constant 0 : index
    %c0_85 = arith.constant 0 : index
    %146 = vector.load %arg4[%c7_83, %c0_84, %c0_85] : memref<8x4x128xf32, #tpu.memory_space<vmem>>, vector<1x4x128xf32>
    %147 = vector.shape_cast %146 : vector<1x4x128xf32> to vector<4x128xf32>
    %c7_86 = arith.constant 7 : index
    %c0_87 = arith.constant 0 : index
    %c0_88 = arith.constant 0 : index
    %148 = vector.load %arg5[%c7_86, %c0_87, %c0_88] : memref<8x4x128xf32, #tpu.memory_space<vmem>>, vector<1x4x128xf32>
    %149 = vector.shape_cast %148 : vector<1x4x128xf32> to vector<4x128xf32>
    %150 = vector.broadcast %143 : vector<1x128xf32> to vector<4x128xf32>
    %151 = arith.mulf %147, %150 : vector<4x128xf32>
    %152 = vector.broadcast %145 : vector<1x128xf32> to vector<4x128xf32>
    %153 = arith.mulf %149, %152 : vector<4x128xf32>
    %154 = arith.subf %151, %153 : vector<4x128xf32>
    %155 = arith.addf %135, %154 : vector<4x128xf32>
    %156 = vector.broadcast %145 : vector<1x128xf32> to vector<4x128xf32>
    %157 = arith.mulf %147, %156 : vector<4x128xf32>
    %158 = vector.broadcast %143 : vector<1x128xf32> to vector<4x128xf32>
    %159 = arith.mulf %149, %158 : vector<4x128xf32>
    %160 = arith.addf %157, %159 : vector<4x128xf32>
    %161 = arith.addf %141, %160 : vector<4x128xf32>
    %c0_89 = arith.constant 0 : index
    %c0_90 = arith.constant 0 : index
    %c0_91 = arith.constant 0 : index
    %162 = vector.load %arg6[%c0_89, %c0_90, %c0_91] : memref<1x4x128xf32, #tpu.memory_space<vmem>>, vector<1x4x128xf32>
    %163 = vector.shape_cast %162 : vector<1x4x128xf32> to vector<4x128xf32>
    %164 = vector.shape_cast %155 : vector<4x128xf32> to vector<1x4x128xf32>
    tpu.vector_store %arg6[%c0_89, %c0_90, %c0_91], %164 {strides = array<i32>} : memref<1x4x128xf32, #tpu.memory_space<vmem>>, vector<1x4x128xf32>,
    %c0_92 = arith.constant 0 : index
    %c0_93 = arith.constant 0 : index
    %c0_94 = arith.constant 0 : index
    %165 = vector.load %arg7[%c0_92, %c0_93, %c0_94] : memref<1x4x128xf32, #tpu.memory_space<vmem>>, vector<1x4x128xf32>
    %166 = vector.shape_cast %165 : vector<1x4x128xf32> to vector<4x128xf32>
    %167 = vector.shape_cast %161 : vector<4x128xf32> to vector<1x4x128xf32>
    tpu.vector_store %arg7[%c0_92, %c0_93, %c0_94], %167 {strides = array<i32>} : memref<1x4x128xf32, #tpu.memory_space<vmem>>, vector<1x4x128xf32>,
    return
  }
  func.func @transform_0(%arg0: i32, %arg1: i32) -> (i32, i32, i32) {
    %c0_i32 = arith.constant 0 : i32
    %c0_i32_0 = arith.constant 0 : i32
    return %arg1, %c0_i32, %arg0 : i32, i32, i32
  }
  func.func @transform_1(%arg0: i32, %arg1: i32) -> (i32, i32, i32) {
    %c0_i32 = arith.constant 0 : i32
    %c0_i32_0 = arith.constant 0 : i32
    return %arg1, %c0_i32, %arg0 : i32, i32, i32
  }
  func.func @transform_2(%arg0: i32, %arg1: i32) -> (i32, i32, i32) {
    %c0_i32 = arith.constant 0 : i32
    %c0_i32_0 = arith.constant 0 : i32
    %c0_i32_1 = arith.constant 0 : i32
    return %c0_i32, %c0_i32_0, %arg0 : i32, i32, i32
  }
  func.func @transform_3(%arg0: i32, %arg1: i32) -> (i32, i32, i32) {
    %c0_i32 = arith.constant 0 : i32
    %c0_i32_0 = arith.constant 0 : i32
    %c0_i32_1 = arith.constant 0 : i32
    return %c0_i32, %c0_i32_0, %arg0 : i32, i32, i32
  }
  func.func @transform_4(%arg0: i32, %arg1: i32) -> (i32, i32, i32) {
    %c0_i32 = arith.constant 0 : i32
    %c0_i32_0 = arith.constant 0 : i32
    return %arg1, %c0_i32, %arg0 : i32, i32, i32
  }
  func.func @transform_5(%arg0: i32, %arg1: i32) -> (i32, i32, i32) {
    %c0_i32 = arith.constant 0 : i32
    %c0_i32_0 = arith.constant 0 : i32
    return %arg1, %c0_i32, %arg0 : i32, i32, i32
  }
}

module attributes {stable_mosaic.version = 11 : i64} {
  func.func @_conv1x1_kernel(%arg0: i32, %arg1: i32, %arg2: memref<1x8x512xf32, #tpu.memory_space<vmem>>, %arg3: memref<4x8xf32, #tpu.memory_space<vmem>>, %arg4: memref<4x1xf32, #tpu.memory_space<vmem>>, %arg5: memref<1x4x512xf32, #tpu.memory_space<vmem>>, %arg6: memref<1x4x512xf32, #tpu.memory_space<vmem>>) attributes {dimension_semantics = [#tpu.dimension_semantics<parallel>, #tpu.dimension_semantics<parallel>], iteration_bounds = array<i64: 2, 1>, scalar_prefetch = 0 : i64, scratch_operands = 0 : i64, tpu.core_type = #tpu.core_type<tc>, window_params = [{transform_indices = @transform_0, window_bounds = array<i64: 1, 8, 512>}, {pipeline_mode = #tpu.pipeline_mode<synchronous>, transform_indices = @transform_1, window_bounds = array<i64: 4, 8>}, {pipeline_mode = #tpu.pipeline_mode<synchronous>, transform_indices = @transform_2, window_bounds = array<i64: 4, 1>}, {transform_indices = @transform_3, window_bounds = array<i64: 1, 4, 512>}, {transform_indices = @transform_4, window_bounds = array<i64: 1, 4, 512>}]} {
    %c0 = arith.constant 0 : index
    %c0_0 = arith.constant 0 : index
    %0 = vector.load %arg3[%c0, %c0_0] : memref<4x8xf32, #tpu.memory_space<vmem>>, vector<4x8xf32>
    %c0_1 = arith.constant 0 : index
    %c0_2 = arith.constant 0 : index
    %c0_3 = arith.constant 0 : index
    %1 = vector.load %arg2[%c0_1, %c0_2, %c0_3] : memref<1x8x512xf32, #tpu.memory_space<vmem>>, vector<1x8x512xf32>
    %2 = vector.shape_cast %1 : vector<1x8x512xf32> to vector<8x512xf32>
    %cst = arith.constant dense<0.000000e+00> : vector<4x512xf32>
    %3 = tpu.matmul %0, %2, %cst {dimension_numbers = #tpu.dot_dimension_numbers<[1], [0], [0], [1], [0, 0, 1, 1], [], []>} : vector<4x8xf32>, vector<8x512xf32>, vector<4x512xf32> -> vector<4x512xf32>
    %c0_4 = arith.constant 0 : index
    %c0_5 = arith.constant 0 : index
    %4 = vector.load %arg4[%c0_4, %c0_5] : memref<4x1xf32, #tpu.memory_space<vmem>>, vector<4x1xf32>
    %5 = vector.broadcast %4 : vector<4x1xf32> to vector<4x512xf32>
    %6 = arith.addf %3, %5 : vector<4x512xf32>
    %c0_6 = arith.constant 0 : index
    %c0_7 = arith.constant 0 : index
    %c0_8 = arith.constant 0 : index
    %7 = vector.load %arg5[%c0_6, %c0_7, %c0_8] : memref<1x4x512xf32, #tpu.memory_space<vmem>>, vector<1x4x512xf32>
    %8 = vector.shape_cast %7 : vector<1x4x512xf32> to vector<4x512xf32>
    %9 = arith.addf %6, %8 : vector<4x512xf32>
    %c0_9 = arith.constant 0 : index
    %c0_10 = arith.constant 0 : index
    %c0_11 = arith.constant 0 : index
    %10 = vector.load %arg6[%c0_9, %c0_10, %c0_11] : memref<1x4x512xf32, #tpu.memory_space<vmem>>, vector<1x4x512xf32>
    %11 = vector.shape_cast %10 : vector<1x4x512xf32> to vector<4x512xf32>
    %12 = vector.shape_cast %9 : vector<4x512xf32> to vector<1x4x512xf32>
    tpu.vector_store %arg6[%c0_9, %c0_10, %c0_11], %12 {strides = array<i32>} : memref<1x4x512xf32, #tpu.memory_space<vmem>>, vector<1x4x512xf32>,
    return
  }
  func.func @transform_0(%arg0: i32, %arg1: i32) -> (i32, i32, i32) {
    %c0_i32 = arith.constant 0 : i32
    %c0_i32_0 = arith.constant 0 : i32
    return %arg0, %c0_i32, %arg1 : i32, i32, i32
  }
  func.func @transform_1(%arg0: i32, %arg1: i32) -> (i32, i32) {
    %c0_i32 = arith.constant 0 : i32
    %c0_i32_0 = arith.constant 0 : i32
    %c0_i32_1 = arith.constant 0 : i32
    return %c0_i32, %c0_i32_0 : i32, i32
  }
  func.func @transform_2(%arg0: i32, %arg1: i32) -> (i32, i32) {
    %c0_i32 = arith.constant 0 : i32
    %c0_i32_0 = arith.constant 0 : i32
    %c0_i32_1 = arith.constant 0 : i32
    return %c0_i32, %c0_i32_0 : i32, i32
  }
  func.func @transform_3(%arg0: i32, %arg1: i32) -> (i32, i32, i32) {
    %c0_i32 = arith.constant 0 : i32
    %c0_i32_0 = arith.constant 0 : i32
    return %arg0, %c0_i32, %arg1 : i32, i32, i32
  }
  func.func @transform_4(%arg0: i32, %arg1: i32) -> (i32, i32, i32) {
    %c0_i32 = arith.constant 0 : i32
    %c0_i32_0 = arith.constant 0 : i32
    return %arg0, %c0_i32, %arg1 : i32, i32, i32
  }
}

</mosaic_0001>

<bundles_post_ra>
// kernel: fno3d_mae_forward.15
= control target key start
LH: loop header
LB: loop body
LE: loop exit
PB: predicated region body
PF: predicated region fallthrough
CT: control target
= control target key end

     0   :  { %s504_s12 = smov 0   ;;  %s506_s13 = smov 0   ;;  %s543_s0 = inlined_call_operand.vmem [shape: f32[2,4,512], index: 0, kind: input, shape index: {}]   ;;  %s544_s1 = inlined_call_operand.vmem [shape: f32[8,4], index: 1, kind: input, shape index: {}]   ;;  %s545_s2 = inlined_call_operand.vmem [shape: f32[8,1], index: 2, kind: input, shape index: {}]   ;;  %s546_s3 = inlined_call_operand.vmem [shape: f32[2,8,512], index: 3, kind: output, shape index: {}]  }
   0x1   :  { %s508_s14 = smov 0  }
   0x2 LB: > { %s25_s15 = sadd.s32 1, %s477_s13  ;;  %p416_p0 = scmp.ge.s32.totalorder %s481_s14, 1  ;;  %s481_s14 = sphi %s508_s14, %s13_s14   ;;  %s477_s13 = sphi %s506_s13, %s548_s13   ;;  %s473_s12 = sphi %s504_s12, %s547_s12  }
   0x3   : > { %p27_p1 = scmp.ge.s32.totalorder %s25_s15, 2  ;;  %p158_p2 = scmp.lt.s32.totalorder %s481_s14, 3 }
   0x5   : > { %s550_s15 = smov (%p27_p1, %s25_s15), 0  ;;  %p159_p3 = pnand %p416_p0, %p158_p2 }
   0x6   : > { %p191_p4 = scmp.lt.s32.totalorder (!%p159_p3), %s473_s12, 1 }
   0x7   : > { %162 = sbr.rel (%p159_p3) target bundleno = 161 (0xa1), region = 32 }
   0xc   : > { %v213_v0 = vld [vmem:[%s545_s2] sm:$0xff]  ;;  %v483_v1 = vmov 0   ;;  %s552_s12 = smov (!%p191_p4, %s473_s12), 1  ;;  %vm232_vm0 = vcmask 1043456   ;;  %vm228_vm1 = vcmask 31744  }
   0xd   : > { %458 = vset.pattern.permute.xlu0 %v483_v1  ;;  %s431_s18 = sshll.u32 %s552_s12, 4  ;;  %v210_v4 = vld [vmem:[%s544_s1] sm:$0xff]  ;;  %s432_s24 = sshll.u32 %s552_s12, 5 }
   0xe   : > { %216 = vperm.xlu0 %458, %v213_v0   ;;  %s198_s21 = scalar_lea.vmem %s543_s0, %s431_s18  ;;  %s208_s27 = scalar_lea.vmem %s546_s3, %s432_s24 }
   0xf   : > { %v212_v2 = vld [vmem:[%s198_s21 + $0x8] sm:$0xff]  ;;  %v211_v3 = vld [vmem:[%s198_s21] sm:$0xff] }
  0x10   : > { %223 = vst [vmem:[#allocation1 + $0x10] ss:$2 sm:$0xff] %v212_v2 }
  0x11   : > { %221 = vst [vmem:[#allocation1] ss:$2 sm:$0xff] %v211_v3 }
  0x17   : > { %v226_v5 = vld.sshfl [vmem:[#allocation1 + $0x10] sm:$0xff pattern:$0x75316420]  ;;  %v227_v6 = vld.sshfl [vmem:[#allocation1 + $0x18] sm:$0xff pattern:$0x75316420] }
  0x18   : > { %425 = vmatpush.msk.msra.mxu2 %vm232_vm0, %v226_v5  ;;  %427 = vmatpush.msk.msra.mxu3 %vm232_vm0, %v227_v6  ;;  %v224_v7 = vld.sshfl [vmem:[#allocation1] sm:$0xff pattern:$0x75316420]  ;;  %v225_v8 = vld.sshfl [vmem:[#allocation1 + $0x8] sm:$0xff pattern:$0x75316420] }
  0x19   : > { %426 = vmatmul.msk.f32.vlgmr.msra.gmra.mxu2 %vm228_vm1, %v210_v4  ;;  %428 = vmatmul.msk.f32.vlgmr.msra.gmra.mxu3 %vm228_vm1, %v210_v4 }
  0x1a   : > { %421 = vmatpush.msk.msra.mxu0 %vm232_vm0, %v224_v7  ;;  %423 = vmatpush.msk.msra.mxu1 %vm232_vm0, %v225_v8 }
  0x1b   : > { %422 = vmatmul.msk.f32.vlgmr.msra.gmra.mxu0 %vm228_vm1, %v210_v4  ;;  %424 = vmatmul.msk.f32.vlgmr.msra.gmra.mxu1 %vm228_vm1, %v210_v4 }
  0x80   : > { %v217_v9 = vpop.permute.xlu0 %216 }
  0x98   : > { %v258_v10 = vpop.f32.mrf.mxu0  ;;  %v278_v11 = vpop.f32.mrf.mxu1 }
  0x99   : > { %v259_v12 = vadd.f32 %v258_v10, %v217_v9  ;;  %v279_v13 = vadd.f32 %v278_v11, %v217_v9 }
  0x9b   : > { %321 = vst [vmem:[%s208_s27] sm:$0xff] %v259_v12 }
  0x9c   : > { %322 = vst [vmem:[%s208_s27 + $0x8] sm:$0xff] %v279_v13  ;;  %v298_v14 = vpop.f32.mrf.mxu2  ;;  %v318_v15 = vpop.f32.mrf.mxu3 }
  0x9d   : > { %v299_v16 = vadd.f32 %v298_v14, %v217_v9  ;;  %v319_v17 = vadd.f32 %v318_v15, %v217_v9 }
  0x9f   : > { %323 = vst [vmem:[%s208_s27 + $0x10] sm:$0xff] %v299_v16 }
  0xa0   : > { %324 = vst [vmem:[%s208_s27 + $0x18] sm:$0xff] %v319_v17 }
  0xa1 PF: > { %s13_s14 = sadd.s32 1, %s481_s14   ;;  %s547_s12 = smov %s477_s13 }
  0xa2   : > { %p10_p5 = scmp.ge.s32.totalorder %s13_s14, 4   ;;  %s548_s13 = smov %s550_s15 }
  0xa4   :  { %12 = sbr.rel (!%p10_p5) target bundleno = 2 (0x2), region = 63 }

// kernel: fno3d_mae_forward.16
= control target key start
LH: loop header
LB: loop body
LE: loop exit
PB: predicated region body
PF: predicated region fallthrough
CT: control target
= control target key end

     0   :  { %s742_s18 = smov 0   ;;  %s744_s19 = smov 0   ;;  %s855_s0 = inlined_call_operand.vmem [shape: f32[2,8,128], index: 0, kind: input, shape index: {}]   ;;  %s856_s1 = inlined_call_operand.vmem [shape: f32[2,8,128], index: 1, kind: input, shape index: {}]   ;;  %s857_s2 = inlined_call_operand.vmem [shape: f32[8,8,128], index: 2, kind: input, shape index: {}]   ;;  %s858_s3 = inlined_call_operand.vmem [shape: f32[8,8,128], index: 3, kind: input, shape index: {}]   ;;  %s859_s4 = inlined_call_operand.vmem [shape: f32[2,8,128], index: 4, kind: output, shape index: {0}]   ;;  %s860_s5 = inlined_call_operand.vmem [shape: f32[2,8,128], index: 5, kind: output, shape index: {1}]  }
   0x1   :  { %s746_s20 = smov 0  }
   0x2 LB: > { %s25_s21 = sadd.s32 1, %s706_s19  ;;  %p627_p0 = scmp.ge.s32.totalorder %s710_s20, 1  ;;  %s710_s20 = sphi %s746_s20, %s16_s20   ;;  %s706_s19 = sphi %s744_s19, %s862_s19   ;;  %s702_s18 = sphi %s742_s18, %s861_s18  }
   0x3   : > { %p26_p1 = scmp.ge.s32.totalorder %s25_s21, 2  ;;  %p242_p2 = scmp.lt.s32.totalorder %s710_s20, 3 }
   0x5   : > { %s864_s21 = smov (%p26_p1, %s25_s21), 0  ;;  %p243_p3 = pnand %p627_p0, %p242_p2 }
   0x6   : > { %p296_p4 = scmp.lt.s32.totalorder (!%p243_p3), %s702_s18, 1 }
   0x7   : > { %246 = sbr.rel (%p243_p3) target bundleno = 39 (0x27), region = 36 }
   0xc   : > { %s866_s18 = smov (!%p296_p4, %s702_s18), 1  ;;  %v334_v0 = vld [vmem:[%s857_s2] sm:$0xff]  ;;  %v632_v2 = vld [vmem:[%s857_s2 + $0x8] sm:$0xff]  ;;  %v634_v5 = vld [vmem:[%s857_s2 + $0x10] sm:$0xff] }
   0xd   : > { %s760_s22 = sshll.u32 %s866_s18, 3  ;;  %v335_v1 = vld [vmem:[%s858_s3] sm:$0xff]  ;;  %v633_v3 = vld [vmem:[%s858_s3 + $0x8] sm:$0xff]  ;;  %v635_v6 = vld [vmem:[%s858_s3 + $0x10] sm:$0xff] }
   0xe   : > { %s769_s27 = scalar_lea.vmem %s855_s0, %s760_s22  ;;  %s775_s30 = scalar_lea.vmem %s856_s1, %s760_s22  ;;  %v636_v8 = vld [vmem:[%s857_s2 + $0x18] sm:$0xff]  ;;  %v638_v17 = vld [vmem:[%s857_s2 + $0x20] sm:$0xff]  ;;  %v640_v23 = vld [vmem:[%s857_s2 + $0x28] sm:$0xff] }
   0xf   : > { %v672_v4 = vld [vmem:[%s769_s27] ss:$0 sm:$0xff]  ;;  %v674_v10 = vld [vmem:[%s769_s27 + $0x1] ss:$0 sm:$0xff]  ;;  %v637_v12 = vld [vmem:[%s858_s3 + $0x18] sm:$0xff]  ;;  %s324_s17 = scalar_lea.vmem %s859_s4, %s760_s22  ;;  %s331_s24 = scalar_lea.vmem %s860_s5, %s760_s22 }
  0x10   : > { %v673_v7 = vld [vmem:[%s775_s30] ss:$0 sm:$0xff]  ;;  %v337_v9 = vmul.f32 %v672_v4, %v334_v0  ;;  %v675_v11 = vld [vmem:[%s775_s30 + $0x1] ss:$0 sm:$0xff]  ;;  %v343_v13 = vmul.f32 %v672_v4, %v335_v1  ;;  %v676_v15 = vld [vmem:[%s769_s27 + $0x2] ss:$0 sm:$0xff]  ;;  %v353_v20 = vmul.f32 %v674_v10, %v632_v2  ;;  %v359_v26 = vmul.f32 %v674_v10, %v633_v3 }
  0x11   : > { %v339_v14 = vmul.f32 %v673_v7, %v335_v1  ;;  %v677_v16 = vld [vmem:[%s775_s30 + $0x2] ss:$0 sm:$0xff]  ;;  %v342_v19 = vmul.f32 %v673_v7, %v334_v0  ;;  %v355_v21 = vmul.f32 %v675_v11, %v633_v3  ;;  %v678_v22 = vld [vmem:[%s769_s27 + $0x3] ss:$0 sm:$0xff]  ;;  %v641_v24 = vld [vmem:[%s858_s3 + $0x28] sm:$0xff]  ;;  %v358_v25 = vmul.f32 %v675_v11, %v632_v2 }
  0x12   : > { %v639_v18 = vld [vmem:[%s858_s3 + $0x20] sm:$0xff]  ;;  %v369_v28 = vmul.f32 %v676_v15, %v634_v5  ;;  %v371_v29 = vmul.f32 %v677_v16, %v635_v6  ;;  %v642_v31 = vld [vmem:[%s857_s2 + $0x30] sm:$0xff]  ;;  %v385_v34 = vmul.f32 %v678_v22, %v636_v8  ;;  %v374_v39 = vmul.f32 %v677_v16, %v634_v5  ;;  %v644_v44 = vld [vmem:[%s857_s2 + $0x38] sm:$0xff] }
  0x13   : > { %v340_v27 = vsub.f32 %v337_v9, %v339_v14  ;;  %v679_v30 = vld [vmem:[%s775_s30 + $0x3] ss:$0 sm:$0xff]  ;;  %v344_v32 = vadd.f32 %v343_v13, %v342_v19  ;;  %v356_v33 = vsub.f32 %v353_v20, %v355_v21  ;;  %v680_v35 = vld [vmem:[%s769_s27 + $0x4] ss:$0 sm:$0xff]  ;;  %v643_v37 = vld [vmem:[%s858_s3 + $0x30] sm:$0xff]  ;;  %v360_v38 = vadd.f32 %v359_v26, %v358_v25 }
  0x14   : > { %v681_v36 = vld [vmem:[%s775_s30 + $0x4] ss:$0 sm:$0xff]  ;;  %v372_v40 = vsub.f32 %v369_v28, %v371_v29  ;;  %v387_v41 = vmul.f32 %v679_v30, %v637_v12  ;;  %v682_v42 = vld [vmem:[%s769_s27 + $0x5] ss:$0 sm:$0xff]  ;;  %v645_v45 = vld [vmem:[%s858_s3 + $0x38] sm:$0xff]  ;;  %v375_v46 = vmul.f32 %v676_v15, %v635_v6  ;;  %v390_v47 = vmul.f32 %v679_v30, %v636_v8 }
  0x15   : > { %v683_v43 = vld [vmem:[%s775_s30 + $0x5] ss:$0 sm:$0xff]  ;;  %v357_v48 = vadd.f32 %v356_v33, %v340_v27  ;;  %v401_v49 = vmul.f32 %v680_v35, %v638_v17  ;;  %v403_v50 = vmul.f32 %v681_v36, %v639_v18  ;;  %v684_v51 = vld [vmem:[%s769_s27 + $0x6] ss:$0 sm:$0xff]  ;;  %v361_v52 = vadd.f32 %v360_v38, %v344_v32  ;;  %v686_v61 = vld [vmem:[%s769_s27 + $0x7] ss:$0 sm:$0xff] }
  0x16   : > { %v388_v53 = vsub.f32 %v385_v34, %v387_v41  ;;  %v417_v54 = vmul.f32 %v682_v42, %v640_v23  ;;  %v419_v55 = vmul.f32 %v683_v43, %v641_v24  ;;  %v685_v56 = vld [vmem:[%s775_s30 + $0x6] ss:$0 sm:$0xff]  ;;  %v376_v57 = vadd.f32 %v375_v46, %v374_v39  ;;  %v687_v62 = vld [vmem:[%s775_s30 + $0x7] ss:$0 sm:$0xff] }
  0x17   : > { %v373_v58 = vadd.f32 %v372_v40, %v357_v48  ;;  %v404_v59 = vsub.f32 %v401_v49, %v403_v50  ;;  %v433_v60 = vmul.f32 %v684_v51, %v642_v31  ;;  %v391_v63 = vmul.f32 %v678_v22, %v637_v12 }
  0x18   : > { %v420_v0 = vsub.f32 %v417_v54, %v419_v55  ;;  %v435_v1 = vmul.f32 %v685_v56, %v643_v37  ;;  %v377_v2 = vadd.f32 %v376_v57, %v361_v52  ;;  %v406_v3 = vmul.f32 %v681_v36, %v638_v17 }
  0x19   : > { %v389_v4 = vadd.f32 %v388_v53, %v373_v58  ;;  %v449_v5 = vmul.f32 %v686_v61, %v644_v44  ;;  %v451_v6 = vmul.f32 %v687_v62, %v645_v45  ;;  %v392_v7 = vadd.f32 %v391_v63, %v390_v47 }
  0x1a   : > { %v407_v8 = vmul.f32 %v680_v35, %v639_v18  ;;  %v422_v9 = vmul.f32 %v683_v43, %v640_v23  ;;  %v423_v10 = vmul.f32 %v682_v42, %v641_v24  ;;  %v436_v13 = vsub.f32 %v433_v60, %v435_v1 }
  0x1b   : > { %v405_v11 = vadd.f32 %v404_v59, %v389_v4  ;;  %v393_v14 = vadd.f32 %v392_v7, %v377_v2  ;;  %v438_v15 = vmul.f32 %v685_v56, %v642_v31  ;;  %v439_v12 = vmul.f32 %v684_v51, %v643_v37 }
  0x1c   : > { %v408_v16 = vadd.f32 %v407_v8, %v406_v3  ;;  %v424_v19 = vadd.f32 %v423_v10, %v422_v9  ;;  %v454_v20 = vmul.f32 %v687_v62, %v644_v44  ;;  %v452_v22 = vsub.f32 %v449_v5, %v451_v6 }
  0x1d   : > { %v421_v21 = vadd.f32 %v420_v0, %v405_v11  ;;  %v455_v17 = vmul.f32 %v686_v61, %v645_v45  ;;  %v440_v26 = vadd.f32 %v439_v12, %v438_v15 }
  0x1e   : > { %v409_v25 = vadd.f32 %v408_v16, %v393_v14 }
  0x1f   : > { %v437_v27 = vadd.f32 %v436_v13, %v421_v21  ;;  %v456_v23 = vadd.f32 %v455_v17, %v454_v20 }
  0x20   : > { %v425_v18 = vadd.f32 %v424_v19, %v409_v25 }
  0x21   : > { %v453_v24 = vadd.f32 %v452_v22, %v437_v27 }
  0x22   : > { %v441_v28 = vadd.f32 %v440_v26, %v425_v18 }
  0x23   : > { %458 = vst [vmem:[%s324_s17] sm:$0xff] %v453_v24 }
  0x24   : > { %v457_v29 = vadd.f32 %v456_v23, %v441_v28 }
  0x26   : > { %459 = vst [vmem:[%s331_s24] sm:$0xff] %v457_v29 }
  0x27 PF: > { %s16_s20 = sadd.s32 1, %s710_s20   ;;  %s861_s18 = smov %s706_s19 }
  0x28   : > { %p13_p5 = scmp.ge.s32.totalorder %s16_s20, 4   ;;  %s862_s19 = smov %s864_s21 }
  0x2a   :  { %15 = sbr.rel (!%p13_p5) target bundleno = 2 (0x2), region = 101 }

// kernel: reverse.12
= control target key start
LH: loop header
LB: loop body
LE: loop exit
PB: predicated region body
PF: predicated region fallthrough
CT: control target
= control target key end

     0   :  { %s584_s0 = inlined_call_operand.vmem [shape: f32[2,8,8,8,3], index: 0, kind: input, shape index: {}]   ;;  %s585_s1 = inlined_call_operand.vmem [shape: f32[2,8,8,8,3], index: 1, kind: output, shape index: {}]  }
   0x1   :  { %v192_v0 = vld [vmem:[%s584_s0 + $0x10] sm:$0xff]  ;;  %v195_v2 = vld [vmem:[%s584_s0 + $0x28] sm:$0xff]  ;;  %v199_v4 = vld [vmem:[%s584_s0 + $0x40] sm:$0xff] }
   0x2   :  { %v193_v1 = vld [vmem:[%s584_s0 + $0xd0] sm:$0xff]  ;;  %4 = vst [vmem:[%s585_s1] sm:$0xff] %v192_v0  ;;  %v197_v3 = vld [vmem:[%s584_s0 + $0xe8] sm:$0xff]  ;;  %v201_v5 = vld [vmem:[%s584_s0 + $0x100] sm:$0xff] }
   0x3   :  { %194 = vst [vmem:[%s585_s1 + $0xc0] sm:$0xff] %v193_v1  ;;  %v203_v6 = vld [vmem:[%s584_s0 + $0x58] sm:$0xff]  ;;  %v207_v8 = vld [vmem:[%s584_s0 + $0x70] sm:$0xff]  ;;  %v211_v10 = vld [vmem:[%s584_s0 + $0x88] sm:$0xff] }
   0x4   :  { %196 = vst [vmem:[%s585_s1 + $0x18] sm:$0xff] %v195_v2  ;;  %v205_v7 = vld [vmem:[%s584_s0 + $0x118] sm:$0xff]  ;;  %v209_v9 = vld [vmem:[%s584_s0 + $0x130] sm:$0xff]  ;;  %v213_v11 = vld [vmem:[%s584_s0 + $0x148] sm:$0xff] }
   0x5   :  { %198 = vst [vmem:[%s585_s1 + $0xd8] sm:$0xff] %v197_v3  ;;  %v215_v12 = vld [vmem:[%s584_s0 + $0xa0] sm:$0xff]  ;;  %v219_v14 = vld [vmem:[%s584_s0 + $0xb8] sm:$0xff]  ;;  %v223_v16 = vld [vmem:[%s584_s0 + $0x8] sm:$0xff] }
   0x6   :  { %200 = vst [vmem:[%s585_s1 + $0x30] sm:$0xff] %v199_v4  ;;  %v217_v13 = vld [vmem:[%s584_s0 + $0x160] sm:$0xff]  ;;  %v221_v15 = vld [vmem:[%s584_s0 + $0x178] sm:$0xff]  ;;  %v225_v17 = vld [vmem:[%s584_s0 + $0xc8] sm:$0xff] }
   0x7   :  { %202 = vst [vmem:[%s585_s1 + $0xf0] sm:$0xff] %v201_v5  ;;  %v227_v18 = vld [vmem:[%s584_s0 + $0x20] sm:$0xff]  ;;  %v231_v20 = vld [vmem:[%s584_s0 + $0x38] sm:$0xff]  ;;  %v235_v22 = vld [vmem:[%s584_s0 + $0x50] sm:$0xff] }
   0x8   :  { %204 = vst [vmem:[%s585_s1 + $0x48] sm:$0xff] %v203_v6  ;;  %v229_v19 = vld [vmem:[%s584_s0 + $0xe0] sm:$0xff]  ;;  %v233_v21 = vld [vmem:[%s584_s0 + $0xf8] sm:$0xff]  ;;  %v237_v23 = vld [vmem:[%s584_s0 + $0x110] sm:$0xff] }
   0x9   :  { %206 = vst [vmem:[%s585_s1 + $0x108] sm:$0xff] %v205_v7  ;;  %v239_v24 = vld [vmem:[%s584_s0 + $0x68] sm:$0xff]  ;;  %v243_v26 = vld [vmem:[%s584_s0 + $0x80] sm:$0xff]  ;;  %v247_v28 = vld [vmem:[%s584_s0 + $0x98] sm:$0xff] }
   0xa   :  { %208 = vst [vmem:[%s585_s1 + $0x60] sm:$0xff] %v207_v8  ;;  %v241_v25 = vld [vmem:[%s584_s0 + $0x128] sm:$0xff]  ;;  %v245_v27 = vld [vmem:[%s584_s0 + $0x140] sm:$0xff]  ;;  %v249_v29 = vld [vmem:[%s584_s0 + $0x158] sm:$0xff] }
   0xb   :  { %210 = vst [vmem:[%s585_s1 + $0x120] sm:$0xff] %v209_v9  ;;  %v251_v30 = vld [vmem:[%s584_s0 + $0xb0] sm:$0xff]  ;;  %v129_v32 = vld [vmem:[%s584_s0] sm:$0xff]  ;;  %v258_v34 = vld [vmem:[%s584_s0 + $0x18] sm:$0xff] }
   0xc   :  { %212 = vst [vmem:[%s585_s1 + $0x78] sm:$0xff] %v211_v10  ;;  %v253_v31 = vld [vmem:[%s584_s0 + $0x170] sm:$0xff]  ;;  %v256_v33 = vld [vmem:[%s584_s0 + $0xc0] sm:$0xff]  ;;  %v260_v35 = vld [vmem:[%s584_s0 + $0xd8] sm:$0xff] }
   0xd   :  { %214 = vst [vmem:[%s585_s1 + $0x138] sm:$0xff] %v213_v11  ;;  %v262_v36 = vld [vmem:[%s584_s0 + $0x30] sm:$0xff]  ;;  %v266_v38 = vld [vmem:[%s584_s0 + $0x48] sm:$0xff]  ;;  %v270_v40 = vld [vmem:[%s584_s0 + $0x60] sm:$0xff] }
   0xe   :  { %216 = vst [vmem:[%s585_s1 + $0x90] sm:$0xff] %v215_v12  ;;  %v264_v37 = vld [vmem:[%s584_s0 + $0xf0] sm:$0xff]  ;;  %v268_v39 = vld [vmem:[%s584_s0 + $0x108] sm:$0xff]  ;;  %v272_v41 = vld [vmem:[%s584_s0 + $0x120] sm:$0xff] }
   0xf   :  { %218 = vst [vmem:[%s585_s1 + $0x150] sm:$0xff] %v217_v13  ;;  %v274_v42 = vld [vmem:[%s584_s0 + $0x78] sm:$0xff]  ;;  %v278_v44 = vld [vmem:[%s584_s0 + $0x90] sm:$0xff]  ;;  %v282_v46 = vld [vmem:[%s584_s0 + $0xa8] sm:$0xff] }
  0x10   :  { %220 = vst [vmem:[%s585_s1 + $0xa8] sm:$0xff] %v219_v14  ;;  %v276_v43 = vld [vmem:[%s584_s0 + $0x138] sm:$0xff]  ;;  %v280_v45 = vld [vmem:[%s584_s0 + $0x150] sm:$0xff]  ;;  %v284_v47 = vld [vmem:[%s584_s0 + $0x168] sm:$0xff] }
  0x11   :  { %222 = vst [vmem:[%s585_s1 + $0x168] sm:$0xff] %v221_v15 }
  0x12   :  { %224 = vst [vmem:[%s585_s1 + $0x8] sm:$0xff] %v223_v16 }
  0x13   :  { %226 = vst [vmem:[%s585_s1 + $0xc8] sm:$0xff] %v225_v17 }
  0x14   :  { %228 = vst [vmem:[%s585_s1 + $0x20] sm:$0xff] %v227_v18 }
  0x15   :  { %230 = vst [vmem:[%s585_s1 + $0xe0] sm:$0xff] %v229_v19 }
  0x16   :  { %232 = vst [vmem:[%s585_s1 + $0x38] sm:$0xff] %v231_v20 }
  0x17   :  { %234 = vst [vmem:[%s585_s1 + $0xf8] sm:$0xff] %v233_v21 }
  0x18   :  { %236 = vst [vmem:[%s585_s1 + $0x50] sm:$0xff] %v235_v22 }
  0x19   :  { %238 = vst [vmem:[%s585_s1 + $0x110] sm:$0xff] %v237_v23 }
  0x1a   :  { %240 = vst [vmem:[%s585_s1 + $0x68] sm:$0xff] %v239_v24 }
  0x1b   :  { %242 = vst [vmem:[%s585_s1 + $0x128] sm:$0xff] %v241_v25 }
  0x1c   :  { %244 = vst [vmem:[%s585_s1 + $0x80] sm:$0xff] %v243_v26 }
  0x1d   :  { %246 = vst [vmem:[%s585_s1 + $0x140] sm:$0xff] %v245_v27 }
  0x1e   :  { %248 = vst [vmem:[%s585_s1 + $0x98] sm:$0xff] %v247_v28 }
  0x1f   :  { %250 = vst [vmem:[%s585_s1 + $0x158] sm:$0xff] %v249_v29 }
  0x20   :  { %252 = vst [vmem:[%s585_s1 + $0xb0] sm:$0xff] %v251_v30 }
  0x21   :  { %254 = vst [vmem:[%s585_s1 + $0x170] sm:$0xff] %v253_v31 }
  0x22   :  { %255 = vst [vmem:[%s585_s1 + $0x10] sm:$0xff] %v129_v32 }
  0x23   :  { %257 = vst [vmem:[%s585_s1 + $0xd0] sm:$0xff] %v256_v33 }
  0x24   :  { %259 = vst [vmem:[%s585_s1 + $0x28] sm:$0xff] %v258_v34 }
  0x25   :  { %261 = vst [vmem:[%s585_s1 + $0xe8] sm:$0xff] %v260_v35 }
  0x26   :  { %263 = vst [vmem:[%s585_s1 + $0x40] sm:$0xff] %v262_v36 }
  0x27   :  { %265 = vst [vmem:[%s585_s1 + $0x100] sm:$0xff] %v264_v37 }
  0x28   :  { %267 = vst [vmem:[%s585_s1 + $0x58] sm:$0xff] %v266_v38 }
  0x29   :  { %269 = vst [vmem:[%s585_s1 + $0x118] sm:$0xff] %v268_v39 }
  0x2a   :  { %271 = vst [vmem:[%s585_s1 + $0x70] sm:$0xff] %v270_v40 }
  0x2b   :  { %273 = vst [vmem:[%s585_s1 + $0x130] sm:$0xff] %v272_v41 }
  0x2c   :  { %275 = vst [vmem:[%s585_s1 + $0x88] sm:$0xff] %v274_v42 }
  0x2d   :  { %277 = vst [vmem:[%s585_s1 + $0x148] sm:$0xff] %v276_v43 }
  0x2e   :  { %279 = vst [vmem:[%s585_s1 + $0xa0] sm:$0xff] %v278_v44 }
  0x2f   :  { %281 = vst [vmem:[%s585_s1 + $0x160] sm:$0xff] %v280_v45 }
  0x30   :  { %283 = vst [vmem:[%s585_s1 + $0xb8] sm:$0xff] %v282_v46 }
  0x31   :  { %285 = vst [vmem:[%s585_s1 + $0x178] sm:$0xff] %v284_v47 }

// kernel: fno3d_mae_forward.17
= control target key start
LH: loop header
LB: loop body
LE: loop exit
PB: predicated region body
PF: predicated region fallthrough
CT: control target
= control target key end

     0   :  { %s767_s15 = smov 0   ;;  %s769_s16 = smov 0   ;;  %s871_s0 = inlined_call_operand.vmem [shape: f32[2,8,512], index: 0, kind: input, shape index: {}]   ;;  %s872_s1 = inlined_call_operand.vmem [shape: f32[8,8], index: 1, kind: input, shape index: {}]   ;;  %s873_s2 = inlined_call_operand.vmem [shape: f32[8,1], index: 2, kind: input, shape index: {}]   ;;  %s874_s3 = inlined_call_operand.vmem [shape: f32[2,8,512], index: 3, kind: input, shape index: {}]   ;;  %s875_s4 = inlined_call_operand.vmem [shape: f32[2,8,512], index: 4, kind: output, shape index: {}]  }
   0x1   :  { %s771_s17 = smov 0  }
   0x2 LB: > { %s26_s18 = sadd.s32 1, %s734_s16  ;;  %p649_p0 = scmp.ge.s32.totalorder %s738_s17, 1  ;;  %s738_s17 = sphi %s771_s17, %s14_s17   ;;  %s734_s16 = sphi %s769_s16, %s877_s16   ;;  %s730_s15 = sphi %s767_s15, %s876_s15  }
   0x3   : > { %p28_p1 = scmp.ge.s32.totalorder %s26_s18, 2  ;;  %p200_p2 = scmp.lt.s32.totalorder %s738_s17, 3 }
   0x5   : > { %s879_s18 = smov (%p28_p1, %s26_s18), 0  ;;  %p201_p3 = pnand %p649_p0, %p200_p2 }
   0x6   : > { %p244_p4 = scmp.lt.s32.totalorder (!%p201_p3), %s730_s15, 1 }
   0x7   : > { %204 = sbr.rel (%p201_p3) target bundleno = 210 (0xd2), region = 36 }
   0xc   : > { %v278_v0 = vld [vmem:[%s873_s2] sm:$0xff]  ;;  %v740_v1 = vmov 0   ;;  %s881_s15 = smov (!%p244_p4, %s730_s15), 1  ;;  %vm284_vm0 = vcmask 64512  }
   0xd   : > { %699 = vset.pattern.permute.xlu0 %v740_v1  ;;  %s788_s21 = sshll.u32 %s881_s15, 5  ;;  %v273_v2 = vld [vmem:[%s872_s1] sm:$0xff] }
   0xe   : > { %281 = vperm.xlu0 %699, %v278_v0   ;;  %s251_s24 = scalar_lea.vmem %s871_s0, %s788_s21  ;;  %s261_s29 = scalar_lea.vmem %s874_s3, %s788_s21 }
   0xf   : > { %v274_v3 = vld [vmem:[%s251_s24] sm:$0xff]  ;;  %v275_v4 = vld [vmem:[%s251_s24 + $0x8] sm:$0xff]  ;;  %v276_v5 = vld [vmem:[%s251_s24 + $0x10] sm:$0xff]  ;;  %s271_s6 = scalar_lea.vmem %s875_s4, %s788_s21 }
  0x10   : > { %303 = vmatpush.msra.mxu0 %v274_v3  ;;  %323 = vmatpush.msra.mxu1 %v275_v4  ;;  %v277_v6 = vld [vmem:[%s251_s24 + $0x18] sm:$0xff]  ;;  %v368_v9 = vld [vmem:[%s261_s29] sm:$0xff]  ;;  %v369_v11 = vld [vmem:[%s261_s29 + $0x8] sm:$0xff] }
  0x11   : > { %343 = vmatpush.msra.mxu2 %v276_v5  ;;  %363 = vmatpush.msra.mxu3 %v277_v6  ;;  %v370_v21 = vld [vmem:[%s261_s29 + $0x10] sm:$0xff]  ;;  %v371_v23 = vld [vmem:[%s261_s29 + $0x18] sm:$0xff] }
  0x12   : > { %656 = vmatmul.msk.f32.vlgmr.msra.gmra.mxu0 %vm284_vm0, %v273_v2  ;;  %657 = vmatmul.msk.f32.vlgmr.msra.gmra.mxu1 %vm284_vm0, %v273_v2 }
  0x13   : > { %658 = vmatmul.msk.f32.vlgmr.msra.gmra.mxu2 %vm284_vm0, %v273_v2  ;;  %659 = vmatmul.msk.f32.vlgmr.msra.gmra.mxu3 %vm284_vm0, %v273_v2 }
  0x80   : > { %v282_v7 = vpop.permute.xlu0 %281 }
  0x8f   : > { %v305_v8 = vpop.f32.mrf.mxu0  ;;  %v325_v10 = vpop.f32.mrf.mxu1 }
  0x90   : > { %v306_v12 = vadd.f32 %v305_v8, %v282_v7  ;;  %v326_v13 = vadd.f32 %v325_v10, %v282_v7 }
  0x92   : > { %v801_v14 = vadd.f32 %v368_v9, %v306_v12  ;;  %v803_v15 = vadd.f32 %v369_v11, %v326_v13 }
  0x94   : > { %v806_v16 = vmul.f32 0.70710677, %v801_v14  ;;  %v809_v17 = vmul.f32 0.70710677, %v803_v15 }
  0x96   : > { %v388_v18 = vand.u32 2147483647, %v806_v16  ;;  %v389_v19 = vand.u32 2147483647, %v809_v17  ;;  %v345_v20 = vpop.f32.mrf.mxu2  ;;  %v365_v22 = vpop.f32.mrf.mxu3 }
  0x97   : > { %v346_v24 = vadd.f32 %v345_v20, %v282_v7  ;;  %v366_v25 = vadd.f32 %v365_v22, %v282_v7 }
  0x98   : > { %v392_v26 = vmul.f32 0.3275911, %v388_v18  ;;  %v393_v27 = vmul.f32 0.3275911, %v389_v19  ;;  %v496_v53 = vsub.f32 0.0, %v388_v18  ;;  %v497_v54 = vsub.f32 0.0, %v389_v19 }
  0x99   : > { %v813_v28 = vadd.f32 %v370_v21, %v346_v24  ;;  %v815_v29 = vadd.f32 %v371_v23, %v366_v25 }
  0x9a   : > { %v396_v30 = vadd.f32 1.0, %v392_v26  ;;  %v397_v31 = vadd.f32 1.0, %v393_v27  ;;  %v500_v0 = vmul.f32 %v496_v53, %v388_v18  ;;  %v501_v2 = vmul.f32 %v497_v54, %v389_v19 }
  0x9b   : > { %v818_v32 = vmul.f32 0.70710677, %v813_v28  ;;  %v821_v33 = vmul.f32 0.70710677, %v815_v29 }
  0x9c   : > { %700 = vrcp.f32 %v396_v30  ;;  %vm405_vm1 = vweird.f32 %v396_v30  ;;  %v411_v44 = vand.u32 2147483648, %v396_v30  ;;  %v409_v48 = vand.u32 2147483647, %v396_v30 }
  0x9d   : > { %702 = vrcp.f32 %v397_v31  ;;  %v824_v34 = vand.u32 2147483647, %v818_v32  ;;  %v828_v36 = vand.u32 2147483647, %v821_v33  ;;  %v426_v49 = vand.u32 2147483648, %v397_v31 }
  0x9e   : > { %vm420_vm3 = vweird.f32 %v397_v31  ;;  %v424_v51 = vand.u32 2147483647, %v397_v31  ;;  %v412_v55 = vor.u32 1.1754944e-38, %v411_v44  ;;  %vm410_vm6 = vcmp.eq.f32.partialorder %v409_v48, 8.507059e+37 }
  0x9f   : > { %v394_v35 = vmul.f32 0.3275911, %v824_v34  ;;  %v395_v42 = vmul.f32 0.3275911, %v828_v36  ;;  %v427_v59 = vor.u32 1.1754944e-38, %v426_v49 }
  0xa0   : > { %vm425_vm8 = vcmp.eq.f32.partialorder %v424_v51, 8.507059e+37  ;;  %v504_v13 = vmul.f32 1.442695, %v500_v0  ;;  %v506_v20 = vmul.f32 1.442695, %v501_v2 }
  0xa1   : > { %v398_v40 = vadd.f32 1.0, %v394_v35  ;;  %v831_v46 = vadd.f32 1.0, %v395_v42 }
  0xa2   : > { %v701_v37 = vpop.eup %700 }
  0xa3   : > { %v703_v38 = vpop.eup %702  ;;  %v401_v39 = vmul.f32 %v701_v37, %v396_v30  ;;  %704 = vrcp.f32 %v398_v40  ;;  %vm406_vm2 = vweird.f32 %v701_v37  ;;  %v439_v5 = vand.u32 2147483647, %v398_v40 }
  0xa4   : > { %v416_v41 = vmul.f32 %v703_v38, %v397_v31  ;;  %vm421_vm4 = vweird.f32 %v703_v38  ;;  %706 = vrcp.f32 %v831_v46  ;;  %vm407_vm5 = vmor %vm405_vm1, %vm406_vm2  ;;  %v441_v8 = vand.u32 2147483648, %v398_v40 }
  0xa5   : > { %v402_v43 = vsub.f32 1.0, %v401_v39  ;;  %vm422_vm7 = vmor %vm420_vm3, %vm421_vm4  ;;  %vm435_vm10 = vweird.f32 %v398_v40  ;;  %vm440_vm11 = vcmp.eq.f32.partialorder %v439_v5, 8.507059e+37  ;;  %v454_v24 = vand.u32 2147483647, %v831_v46 }
  0xa6   : > { %v417_v45 = vsub.f32 1.0, %v416_v41  ;;  %v442_v23 = vor.u32 1.1754944e-38, %v441_v8  ;;  %v456_v25 = vand.u32 2147483648, %v831_v46  ;;  %708 = vpow2.f32 %v504_v13 }
  0xa7   : > { %v403_v47 = vmul.f32 %v701_v37, %v402_v43  ;;  %vm450_vm14 = vweird.f32 %v831_v46  ;;  %710 = vpow2.f32 %v506_v20  ;;  %vm455_vm0 = vcmp.eq.f32.partialorder %v454_v24, 8.507059e+37 }
  0xa8   : > { %v418_v50 = vmul.f32 %v703_v38, %v417_v45  ;;  %v457_v42 = vor.u32 1.1754944e-38, %v456_v25  ;;  %vm380_vm1 = vcmp.ge.f32.partialorder %v806_v16, 0.0  ;;  %vm381_vm2 = vcmp.ge.f32.partialorder %v809_v17, 0.0 }
  0xa9   : > { %v404_v52 = vadd.f32 %v701_v37, %v403_v47  ;;  %v705_v57 = vpop.eup %704  ;;  %v741_v8 = vmov -1.0   ;;  %v524_v20 = vmul.f32 0.5, %v801_v14  ;;  %vm382_vm3 = vcmp.ge.f32.partialorder %v818_v32, 0.0 }
  0xaa   : > { %v419_v56 = vadd.f32 %v703_v38, %v418_v50  ;;  %v431_v62 = vmul.f32 %v705_v57, %v398_v40  ;;  %v707_v6 = vpop.eup %706  ;;  %vm436_vm9 = vweird.f32 %v705_v57  ;;  %v499_v50 = vsub.f32 0.0, %v828_v36 }
  0xab   : > { %v408_v58 = vsel %vm407_vm5, %v701_v37, %v404_v52  ;;  %v446_v11 = vmul.f32 %v707_v6, %v831_v46  ;;  %vm437_vm12 = vmor %vm435_vm10, %vm436_vm9  ;;  %vm451_vm13 = vweird.f32 %v707_v6  ;;  %v498_v37 = vsub.f32 0.0, %v824_v34 }
  0xac   : > { %v835_v60 = vsel %vm410_vm6, %v412_v55, %v408_v58  ;;  %v423_v61 = vsel %vm422_vm7, %v703_v38, %v419_v56  ;;  %v432_v4 = vsub.f32 1.0, %v431_v62  ;;  %vm452_vm15 = vmor %vm450_vm14, %vm451_vm13  ;;  %v709_v54 = vpop.eup %708  ;;  %v503_v62 = vmul.f32 %v499_v50, %v828_v36 }
  0xad   : > { %v460_v63 = vmul.f32 1.0614054, %v835_v60  ;;  %v428_v1 = vsel %vm425_vm8, %v427_v59, %v423_v61  ;;  %v447_v19 = vsub.f32 1.0, %v446_v11  ;;  %v502_v48 = vmul.f32 %v498_v37, %v824_v34  ;;  %v711_v58 = vpop.eup %710 }
  0xae   : > { %v461_v3 = vmul.f32 1.0614054, %v428_v1  ;;  %v433_v10 = vmul.f32 %v705_v57, %v432_v4  ;;  %v385_v11 = vsel %vm381_vm2, 1.0, %v741_v8  ;;  %v386_v37 = vsel %vm382_vm3, 1.0, %v741_v8 }
  0xaf   : > { %v660_v7 = vadd.f32 -1.4531521, %v460_v63  ;;  %v448_v30 = vmul.f32 %v707_v6, %v447_v19  ;;  %v508_v61 = vmul.f32 1.442695, %v502_v48  ;;  %vm383_vm4 = vcmp.ge.f32.partialorder %v821_v33, 0.0 }
  0xb0   : > { %v661_v9 = vadd.f32 -1.4531521, %v461_v3  ;;  %v434_v18 = vadd.f32 %v705_v57, %v433_v10  ;;  %v527_v32 = vmul.f32 0.5, %v815_v29 }
  0xb1   : > { %v468_v12 = vmul.f32 %v660_v7, %v835_v60  ;;  %v449_v40 = vadd.f32 %v707_v6, %v448_v30  ;;  %712 = vpow2.f32 %v508_v61  ;;  %v510_v7 = vmul.f32 1.442695, %v503_v62 }
  0xb2   : > { %v469_v21 = vmul.f32 %v661_v9, %v428_v1  ;;  %v438_v27 = vsel %vm437_vm12, %v705_v57, %v434_v18 }
  0xb3   : > { %v472_v22 = vadd.f32 1.4214138, %v468_v12  ;;  %v443_v35 = vsel %vm440_vm11, %v442_v23, %v438_v27  ;;  %v453_v45 = vsel %vm452_vm15, %v707_v6, %v449_v40  ;;  %714 = vpow2.f32 %v510_v7 }
  0xb4   : > { %v473_v26 = vadd.f32 1.4214138, %v469_v21  ;;  %v462_v39 = vmul.f32 1.0614054, %v443_v35  ;;  %v458_v49 = vsel %vm455_vm0, %v457_v42, %v453_v45  ;;  %v525_v21 = vmul.f32 0.5, %v803_v15 }
  0xb5   : > { %v476_v31 = vmul.f32 %v472_v22, %v835_v60  ;;  %v463_v53 = vmul.f32 1.0614054, %v458_v49 }
  0xb6   : > { %v477_v38 = vmul.f32 %v473_v26, %v428_v1  ;;  %v662_v44 = vadd.f32 -1.4531521, %v462_v39 }
  0xb7   : > { %v664_v41 = vadd.f32 -0.28449672, %v476_v31  ;;  %v663_v57 = vadd.f32 -1.4531521, %v463_v53  ;;  %v713_v23 = vpop.eup %712 }
  0xb8   : > { %v665_v43 = vadd.f32 -0.28449672, %v477_v38  ;;  %v470_v52 = vmul.f32 %v662_v44, %v443_v35 }
  0xb9   : > { %v484_v47 = vmul.f32 %v664_v41, %v835_v60  ;;  %v471_v34 = vmul.f32 %v663_v57, %v458_v49  ;;  %v715_v31 = vpop.eup %714  ;;  %v387_v41 = vsel %vm383_vm4, 1.0, %v741_v8 }
  0xba   : > { %v485_v51 = vmul.f32 %v665_v43, %v428_v1  ;;  %v474_v56 = vadd.f32 1.4214138, %v470_v52 }
  0xbb   : > { %v488_v46 = vadd.f32 0.2548296, %v484_v47  ;;  %v475_v5 = vadd.f32 1.4214138, %v471_v34 }
  0xbc   : > { %v489_v55 = vadd.f32 0.2548296, %v485_v51  ;;  %v478_v0 = vmul.f32 %v474_v56, %v443_v35 }
  0xbd   : > { %v492_v59 = vmul.f32 %v488_v46, %v835_v60  ;;  %v384_v60 = vsel %vm380_vm1, 1.0, %v741_v8  ;;  %v479_v36 = vmul.f32 %v475_v5, %v458_v49 }
  0xbe   : > { %v493_v63 = vmul.f32 %v489_v55, %v428_v1  ;;  %v666_v4 = vadd.f32 -0.28449672, %v478_v0 }
  0xbf   : > { %v512_v2 = vmul.f32 %v709_v54, %v492_v59  ;;  %v667_v16 = vadd.f32 -0.28449672, %v479_v36 }
  0xc0   : > { %v513_v3 = vmul.f32 %v711_v58, %v493_v63  ;;  %v486_v10 = vmul.f32 %v666_v4, %v443_v35 }
  0xc1   : > { %v516_v6 = vsub.f32 1.0, %v512_v2  ;;  %v487_v22 = vmul.f32 %v667_v16, %v458_v49 }
  0xc2   : > { %v517_v9 = vsub.f32 1.0, %v513_v3  ;;  %v490_v13 = vadd.f32 0.2548296, %v486_v10 }
  0xc3   : > { %v520_v1 = vmul.f32 %v516_v6, %v384_v60  ;;  %v491_v27 = vadd.f32 0.2548296, %v487_v22 }
  0xc4   : > { %v521_v12 = vmul.f32 %v517_v9, %v385_v11  ;;  %v494_v19 = vmul.f32 %v490_v13, %v443_v35  ;;  %v526_v35 = vmul.f32 0.5, %v813_v28 }
  0xc5   : > { %v528_v17 = vadd.f32 1.0, %v520_v1  ;;  %v495_v30 = vmul.f32 %v491_v27, %v458_v49 }
  0xc6   : > { %v529_v18 = vadd.f32 1.0, %v521_v12  ;;  %v514_v26 = vmul.f32 %v713_v23, %v494_v19 }
  0xc7   : > { %v532_v24 = vmul.f32 %v528_v17, %v524_v20  ;;  %v515_v15 = vmul.f32 %v715_v31, %v495_v30 }
  0xc8   : > { %v533_v25 = vmul.f32 %v529_v18, %v525_v21  ;;  %v518_v14 = vsub.f32 1.0, %v514_v26 }
  0xc9   : > { %536 = vst [vmem:[%s271_s6] sm:$0xff] %v532_v24  ;;  %v519_v40 = vsub.f32 1.0, %v515_v15 }
  0xca   : > { %537 = vst [vmem:[%s271_s6 + $0x8] sm:$0xff] %v533_v25  ;;  %v522_v38 = vmul.f32 %v518_v14, %v386_v37 }
  0xcb   : > { %v523_v43 = vmul.f32 %v519_v40, %v387_v41 }
  0xcc   : > { %v530_v39 = vadd.f32 1.0, %v522_v38 }
  0xcd   : > { %v531_v44 = vadd.f32 1.0, %v523_v43 }
  0xce   : > { %v534_v42 = vmul.f32 %v530_v39, %v526_v35 }
  0xcf   : > { %v535_v45 = vmul.f32 %v531_v44, %v527_v32 }
  0xd0   : > { %538 = vst [vmem:[%s271_s6 + $0x10] sm:$0xff] %v534_v42 }
  0xd1   : > { %539 = vst [vmem:[%s271_s6 + $0x18] sm:$0xff] %v535_v45 }
  0xd2 PF: > { %s14_s17 = sadd.s32 1, %s738_s17   ;;  %s876_s15 = smov %s734_s16 }
  0xd3   : > { %p11_p5 = scmp.ge.s32.totalorder %s14_s17, 4   ;;  %s877_s16 = smov %s879_s18 }
  0xd5   :  { %13 = sbr.rel (!%p11_p5) target bundleno = 2 (0x2), region = 69 }

// kernel: fno3d_mae_forward.21
= control target key start
LH: loop header
LB: loop body
LE: loop exit
PB: predicated region body
PF: predicated region fallthrough
CT: control target
= control target key end

     0   :  { %s581_s15 = smov 0   ;;  %s583_s16 = smov 0   ;;  %s623_s0 = inlined_call_operand.vmem [shape: f32[2,8,512], index: 0, kind: input, shape index: {}]   ;;  %s624_s1 = inlined_call_operand.vmem [shape: f32[8,8], index: 1, kind: input, shape index: {}]   ;;  %s625_s2 = inlined_call_operand.vmem [shape: f32[8,1], index: 2, kind: input, shape index: {}]   ;;  %s626_s3 = inlined_call_operand.vmem [shape: f32[2,8,512], index: 3, kind: input, shape index: {}]   ;;  %s627_s4 = inlined_call_operand.vmem [shape: f32[2,8,512], index: 4, kind: output, shape index: {}]  }
   0x1   :  { %s585_s17 = smov 0  }
   0x2 LB: > { %s26_s18 = sadd.s32 1, %s549_s16  ;;  %p489_p0 = scmp.ge.s32.totalorder %s553_s17, 1  ;;  %s553_s17 = sphi %s585_s17, %s14_s17   ;;  %s549_s16 = sphi %s583_s16, %s629_s16   ;;  %s545_s15 = sphi %s581_s15, %s628_s15  }
   0x3   : > { %p28_p1 = scmp.ge.s32.totalorder %s26_s18, 2  ;;  %p200_p2 = scmp.lt.s32.totalorder %s553_s17, 3 }
   0x5   : > { %s631_s18 = smov (%p28_p1, %s26_s18), 0  ;;  %p201_p3 = pnand %p489_p0, %p200_p2 }
   0x6   : > { %p244_p4 = scmp.lt.s32.totalorder (!%p201_p3), %s545_s15, 1 }
   0x7   : > { %204 = sbr.rel (%p201_p3) target bundleno = 155 (0x9b), region = 36 }
   0xc   : > { %v278_v0 = vld [vmem:[%s625_s2] sm:$0xff]  ;;  %v555_v1 = vmov 0   ;;  %s633_s15 = smov (!%p244_p4, %s545_s15), 1  ;;  %vm284_vm0 = vcmask 64512  }
   0xd   : > { %530 = vset.pattern.permute.xlu0 %v555_v1  ;;  %s502_s21 = sshll.u32 %s633_s15, 5  ;;  %v273_v2 = vld [vmem:[%s624_s1] sm:$0xff] }
   0xe   : > { %281 = vperm.xlu0 %530, %v278_v0   ;;  %s251_s24 = scalar_lea.vmem %s623_s0, %s502_s21  ;;  %s261_s29 = scalar_lea.vmem %s626_s3, %s502_s21 }
   0xf   : > { %v276_v3 = vld [vmem:[%s251_s24 + $0x10] sm:$0xff]  ;;  %v277_v4 = vld [vmem:[%s251_s24 + $0x18] sm:$0xff]  ;;  %v274_v5 = vld [vmem:[%s251_s24] sm:$0xff]  ;;  %s271_s6 = scalar_lea.vmem %s627_s4, %s502_s21 }
  0x10   : > { %343 = vmatpush.msra.mxu2 %v276_v3  ;;  %363 = vmatpush.msra.mxu3 %v277_v4  ;;  %v275_v6 = vld [vmem:[%s251_s24 + $0x8] sm:$0xff]  ;;  %v368_v9 = vld [vmem:[%s261_s29] sm:$0xff]  ;;  %v370_v17 = vld [vmem:[%s261_s29 + $0x10] sm:$0xff] }
  0x11   : > { %498 = vmatmul.msk.f32.vlgmr.msra.gmra.mxu2 %vm284_vm0, %v273_v2  ;;  %499 = vmatmul.msk.f32.vlgmr.msra.gmra.mxu3 %vm284_vm0, %v273_v2  ;;  %v369_v11 = vld [vmem:[%s261_s29 + $0x8] sm:$0xff]  ;;  %v371_v19 = vld [vmem:[%s261_s29 + $0x18] sm:$0xff] }
  0x12   : > { %303 = vmatpush.msra.mxu0 %v274_v5  ;;  %323 = vmatpush.msra.mxu1 %v275_v6 }
  0x13   : > { %496 = vmatmul.msk.f32.vlgmr.msra.gmra.mxu0 %vm284_vm0, %v273_v2  ;;  %497 = vmatmul.msk.f32.vlgmr.msra.gmra.mxu1 %vm284_vm0, %v273_v2 }
  0x80   : > { %v282_v7 = vpop.permute.xlu0 %281 }
  0x90   : > { %v305_v8 = vpop.f32.mrf.mxu0  ;;  %v325_v10 = vpop.f32.mrf.mxu1 }
  0x91   : > { %v306_v12 = vadd.f32 %v305_v8, %v282_v7  ;;  %v326_v13 = vadd.f32 %v325_v10, %v282_v7 }
  0x93   : > { %v372_v14 = vadd.f32 %v368_v9, %v306_v12  ;;  %v373_v15 = vadd.f32 %v369_v11, %v326_v13 }
  0x94   : > { %v345_v16 = vpop.f32.mrf.mxu2  ;;  %v365_v18 = vpop.f32.mrf.mxu3 }
  0x95   : > { %376 = vst [vmem:[%s271_s6] sm:$0xff] %v372_v14  ;;  %v346_v20 = vadd.f32 %v345_v16, %v282_v7  ;;  %v366_v21 = vadd.f32 %v365_v18, %v282_v7 }
  0x96   : > { %377 = vst [vmem:[%s271_s6 + $0x8] sm:$0xff] %v373_v15 }
  0x97   : > { %v374_v22 = vadd.f32 %v370_v17, %v346_v20  ;;  %v375_v23 = vadd.f32 %v371_v19, %v366_v21 }
  0x99   : > { %378 = vst [vmem:[%s271_s6 + $0x10] sm:$0xff] %v374_v22 }
  0x9a   : > { %379 = vst [vmem:[%s271_s6 + $0x18] sm:$0xff] %v375_v23 }
  0x9b PF: > { %s14_s17 = sadd.s32 1, %s553_s17   ;;  %s628_s15 = smov %s549_s16 }
  0x9c   : > { %p11_p5 = scmp.ge.s32.totalorder %s14_s17, 4   ;;  %s629_s16 = smov %s631_s18 }
  0x9e   :  { %13 = sbr.rel (!%p11_p5) target bundleno = 2 (0x2), region = 69 }

// kernel: fno3d_mae_forward.22
= control target key start
LH: loop header
LB: loop body
LE: loop exit
PB: predicated region body
PF: predicated region fallthrough
CT: control target
= control target key end

     0   :  { %s484_s12 = smov 0   ;;  %s486_s13 = smov 0   ;;  %s523_s0 = inlined_call_operand.vmem [shape: f32[2,8,512], index: 0, kind: input, shape index: {}]   ;;  %s524_s1 = inlined_call_operand.vmem [shape: f32[8,8], index: 1, kind: input, shape index: {}]   ;;  %s525_s2 = inlined_call_operand.vmem [shape: f32[8,1], index: 2, kind: input, shape index: {}]   ;;  %s526_s3 = inlined_call_operand.vmem [shape: f32[2,8,512], index: 3, kind: output, shape index: {}]  }
   0x1   :  { %s488_s14 = smov 0  }
   0x2 LB: > { %s25_s15 = sadd.s32 1, %s457_s13  ;;  %p400_p0 = scmp.ge.s32.totalorder %s461_s14, 1  ;;  %s461_s14 = sphi %s488_s14, %s13_s14   ;;  %s457_s13 = sphi %s486_s13, %s528_s13   ;;  %s453_s12 = sphi %s484_s12, %s527_s12  }
   0x3   : > { %p27_p1 = scmp.ge.s32.totalorder %s25_s15, 2  ;;  %p158_p2 = scmp.lt.s32.totalorder %s461_s14, 3 }
   0x5   : > { %s530_s15 = smov (%p27_p1, %s25_s15), 0  ;;  %p159_p3 = pnand %p400_p0, %p158_p2 }
   0x6   : > { %p191_p4 = scmp.lt.s32.totalorder (!%p159_p3), %s453_s12, 1 }
   0x7   : > { %162 = sbr.rel (%p159_p3) target bundleno = 153 (0x99), region = 32 }
   0xc   : > { %v215_v0 = vld [vmem:[%s525_s2] sm:$0xff]  ;;  %v463_v1 = vmov 0   ;;  %s532_s12 = smov (!%p191_p4, %s453_s12), 1  ;;  %vm221_vm0 = vcmask 64512  }
   0xd   : > { %438 = vset.pattern.permute.xlu0 %v463_v1  ;;  %s411_s18 = sshll.u32 %s532_s12, 5  ;;  %v210_v2 = vld [vmem:[%s524_s1] sm:$0xff] }
   0xe   : > { %218 = vperm.xlu0 %438, %v215_v0   ;;  %s198_s21 = scalar_lea.vmem %s523_s0, %s411_s18  ;;  %s208_s26 = scalar_lea.vmem %s526_s3, %s411_s18 }
   0xf   : > { %v213_v3 = vld [vmem:[%s198_s21 + $0x10] sm:$0xff]  ;;  %v214_v4 = vld [vmem:[%s198_s21 + $0x18] sm:$0xff]  ;;  %v211_v5 = vld [vmem:[%s198_s21] sm:$0xff] }
  0x10   : > { %280 = vmatpush.msra.mxu2 %v213_v3  ;;  %300 = vmatpush.msra.mxu3 %v214_v4  ;;  %v212_v6 = vld [vmem:[%s198_s21 + $0x8] sm:$0xff] }
  0x11   : > { %407 = vmatmul.msk.f32.vlgmr.msra.gmra.mxu2 %vm221_vm0, %v210_v2  ;;  %408 = vmatmul.msk.f32.vlgmr.msra.gmra.mxu3 %vm221_vm0, %v210_v2 }
  0x12   : > { %240 = vmatpush.msra.mxu0 %v211_v5  ;;  %260 = vmatpush.msra.mxu1 %v212_v6 }
  0x13   : > { %405 = vmatmul.msk.f32.vlgmr.msra.gmra.mxu0 %vm221_vm0, %v210_v2  ;;  %406 = vmatmul.msk.f32.vlgmr.msra.gmra.mxu1 %vm221_vm0, %v210_v2 }
  0x80   : > { %v219_v7 = vpop.permute.xlu0 %218 }
  0x90   : > { %v242_v8 = vpop.f32.mrf.mxu0  ;;  %v262_v9 = vpop.f32.mrf.mxu1 }
  0x91   : > { %v243_v10 = vadd.f32 %v242_v8, %v219_v7  ;;  %v263_v11 = vadd.f32 %v262_v9, %v219_v7 }
  0x93   : > { %305 = vst [vmem:[%s208_s26] sm:$0xff] %v243_v10 }
  0x94   : > { %306 = vst [vmem:[%s208_s26 + $0x8] sm:$0xff] %v263_v11  ;;  %v282_v12 = vpop.f32.mrf.mxu2  ;;  %v302_v13 = vpop.f32.mrf.mxu3 }
  0x95   : > { %v283_v14 = vadd.f32 %v282_v12, %v219_v7  ;;  %v303_v15 = vadd.f32 %v302_v13, %v219_v7 }
  0x97   : > { %307 = vst [vmem:[%s208_s26 + $0x10] sm:$0xff] %v283_v14 }
  0x98   : > { %308 = vst [vmem:[%s208_s26 + $0x18] sm:$0xff] %v303_v15 }
  0x99 PF: > { %s13_s14 = sadd.s32 1, %s461_s14   ;;  %s527_s12 = smov %s457_s13 }
  0x9a   : > { %p10_p5 = scmp.ge.s32.totalorder %s13_s14, 4   ;;  %s528_s13 = smov %s530_s15 }
  0x9c   :  { %12 = sbr.rel (!%p10_p5) target bundleno = 2 (0x2), region = 62 }

// kernel: fno3d_mae_forward.28
= control target key start
LH: loop header
LB: loop body
LE: loop exit
PB: predicated region body
PF: predicated region fallthrough
CT: control target
= control target key end

     0   :  { %s742_s18 = smov 0   ;;  %s744_s19 = smov 0   ;;  %s853_s0 = inlined_call_operand.vmem [shape: f32[2,8,128], index: 0, kind: input, shape index: {}]   ;;  %s854_s1 = inlined_call_operand.vmem [shape: f32[2,8,128], index: 1, kind: input, shape index: {}]   ;;  %s855_s2 = inlined_call_operand.vmem [shape: f32[8,4,128], index: 2, kind: input, shape index: {}]   ;;  %s856_s3 = inlined_call_operand.vmem [shape: f32[8,4,128], index: 3, kind: input, shape index: {}]   ;;  %s857_s4 = inlined_call_operand.vmem [shape: f32[2,4,128], index: 4, kind: output, shape index: {0}]   ;;  %s858_s5 = inlined_call_operand.vmem [shape: f32[2,4,128], index: 5, kind: output, shape index: {1}]  }
   0x1   :  { %s746_s20 = smov 0  }
   0x2 LB: > { %s25_s21 = sadd.s32 1, %s706_s19  ;;  %p627_p0 = scmp.ge.s32.totalorder %s710_s20, 1  ;;  %s710_s20 = sphi %s746_s20, %s16_s20   ;;  %s706_s19 = sphi %s744_s19, %s860_s19   ;;  %s702_s18 = sphi %s742_s18, %s859_s18  }
   0x3   : > { %p26_p1 = scmp.ge.s32.totalorder %s25_s21, 2  ;;  %p242_p2 = scmp.lt.s32.totalorder %s710_s20, 3 }
   0x5   : > { %s862_s21 = smov (%p26_p1, %s25_s21), 0  ;;  %p243_p3 = pnand %p627_p0, %p242_p2 }
   0x6   : > { %p296_p4 = scmp.lt.s32.totalorder (!%p243_p3), %s702_s18, 1 }
   0x7   : > { %246 = sbr.rel (%p243_p3) target bundleno = 39 (0x27), region = 36 }
   0xc   : > { %s864_s18 = smov (!%p296_p4, %s702_s18), 1  ;;  %v334_v0 = vld [vmem:[%s855_s2] sm:$0xf]  ;;  %v632_v2 = vld [vmem:[%s855_s2 + $0x4] sm:$0xf] }
   0xd   : > { %s628_s22 = sshll.u32 %s864_s18, 3  ;;  %v335_v1 = vld [vmem:[%s856_s3] sm:$0xf]  ;;  %v633_v3 = vld [vmem:[%s856_s3 + $0x4] sm:$0xf] }
   0xe   : > { %s769_s27 = scalar_lea.vmem %s853_s0, %s628_s22  ;;  %s774_s30 = scalar_lea.vmem %s854_s1, %s628_s22  ;;  %v634_v5 = vld [vmem:[%s855_s2 + $0x8] sm:$0xf]  ;;  %v636_v8 = vld [vmem:[%s855_s2 + $0xc] sm:$0xf]  ;;  %v638_v17 = vld [vmem:[%s855_s2 + $0x10] sm:$0xf] }
   0xf   : > { %v672_v4 = vld [vmem:[%s769_s27] ss:$0 sm:$0xff]  ;;  %v635_v6 = vld [vmem:[%s856_s3 + $0x8] sm:$0xf]  ;;  %v674_v10 = vld [vmem:[%s769_s27 + $0x1] ss:$0 sm:$0xff] }
  0x10   : > { %v673_v7 = vld [vmem:[%s774_s30] ss:$0 sm:$0xff]  ;;  %v337_v9 = vmul.f32 %v672_v4, %v334_v0  ;;  %v675_v11 = vld [vmem:[%s774_s30 + $0x1] ss:$0 sm:$0xff]  ;;  %v637_v12 = vld [vmem:[%s856_s3 + $0xc] sm:$0xf]  ;;  %v343_v13 = vmul.f32 %v672_v4, %v335_v1  ;;  %v353_v20 = vmul.f32 %v674_v10, %v632_v2  ;;  %v359_v26 = vmul.f32 %v674_v10, %v633_v3 }
  0x11   : > { %v339_v14 = vmul.f32 %v673_v7, %v335_v1  ;;  %v676_v15 = vld [vmem:[%s769_s27 + $0x2] ss:$0 sm:$0xff]  ;;  %v639_v18 = vld [vmem:[%s856_s3 + $0x10] sm:$0xf]  ;;  %v342_v19 = vmul.f32 %v673_v7, %v334_v0  ;;  %v355_v21 = vmul.f32 %v675_v11, %v633_v3  ;;  %v678_v22 = vld [vmem:[%s769_s27 + $0x3] ss:$0 sm:$0xff]  ;;  %v358_v25 = vmul.f32 %v675_v11, %v632_v2 }
  0x12   : > { %v677_v16 = vld [vmem:[%s774_s30 + $0x2] ss:$0 sm:$0xff]  ;;  %v640_v23 = vld [vmem:[%s855_s2 + $0x14] sm:$0xf]  ;;  %v369_v28 = vmul.f32 %v676_v15, %v634_v5  ;;  %v679_v30 = vld [vmem:[%s774_s30 + $0x3] ss:$0 sm:$0xff]  ;;  %v385_v34 = vmul.f32 %v678_v22, %v636_v8  ;;  %v375_v45 = vmul.f32 %v676_v15, %v635_v6  ;;  %v391_v63 = vmul.f32 %v678_v22, %v637_v12 }
  0x13   : > { %v641_v24 = vld [vmem:[%s856_s3 + $0x14] sm:$0xf]  ;;  %v340_v27 = vsub.f32 %v337_v9, %v339_v14  ;;  %v371_v29 = vmul.f32 %v677_v16, %v635_v6  ;;  %v642_v31 = vld [vmem:[%s855_s2 + $0x18] sm:$0xf]  ;;  %v344_v32 = vadd.f32 %v343_v13, %v342_v19  ;;  %v356_v33 = vsub.f32 %v353_v20, %v355_v21  ;;  %v680_v35 = vld [vmem:[%s769_s27 + $0x4] ss:$0 sm:$0xff] }
  0x14   : > { %v681_v36 = vld [vmem:[%s774_s30 + $0x4] ss:$0 sm:$0xff]  ;;  %v643_v37 = vld [vmem:[%s856_s3 + $0x18] sm:$0xf]  ;;  %v360_v38 = vadd.f32 %v359_v26, %v358_v25  ;;  %v374_v39 = vmul.f32 %v677_v16, %v634_v5  ;;  %v387_v41 = vmul.f32 %v679_v30, %v637_v12  ;;  %v682_v42 = vld [vmem:[%s769_s27 + $0x5] ss:$0 sm:$0xff]  ;;  %v390_v46 = vmul.f32 %v679_v30, %v636_v8 }
  0x15   : > { %v372_v40 = vsub.f32 %v369_v28, %v371_v29  ;;  %v683_v43 = vld [vmem:[%s774_s30 + $0x5] ss:$0 sm:$0xff]  ;;  %v644_v44 = vld [vmem:[%s855_s2 + $0x1c] sm:$0xf]  ;;  %v357_v47 = vadd.f32 %v356_v33, %v340_v27  ;;  %v401_v48 = vmul.f32 %v680_v35, %v638_v17  ;;  %v403_v49 = vmul.f32 %v681_v36, %v639_v18  ;;  %v684_v50 = vld [vmem:[%s769_s27 + $0x6] ss:$0 sm:$0xff] }
  0x16   : > { %v361_v51 = vadd.f32 %v360_v38, %v344_v32  ;;  %v388_v52 = vsub.f32 %v385_v34, %v387_v41  ;;  %v417_v53 = vmul.f32 %v682_v42, %v640_v23  ;;  %v419_v54 = vmul.f32 %v683_v43, %v641_v24  ;;  %v685_v55 = vld [vmem:[%s774_s30 + $0x6] ss:$0 sm:$0xff]  ;;  %v645_v60 = vld [vmem:[%s856_s3 + $0x1c] sm:$0xf]  ;;  %v686_v61 = vld [vmem:[%s769_s27 + $0x7] ss:$0 sm:$0xff] }
  0x17   : > { %v376_v56 = vadd.f32 %v375_v45, %v374_v39  ;;  %v373_v57 = vadd.f32 %v372_v40, %v357_v47  ;;  %v404_v58 = vsub.f32 %v401_v48, %v403_v49  ;;  %v433_v59 = vmul.f32 %v684_v50, %v642_v31  ;;  %v687_v62 = vld [vmem:[%s774_s30 + $0x7] ss:$0 sm:$0xff]  ;;  %s630_s27 = sshll.u32 %s864_s18, 2 }
  0x18   : > { %v420_v0 = vsub.f32 %v417_v53, %v419_v54  ;;  %v435_v1 = vmul.f32 %v685_v55, %v643_v37  ;;  %v406_v3 = vmul.f32 %v681_v36, %v638_v17  ;;  %v449_v5 = vmul.f32 %v686_v61, %v644_v44  ;;  %s324_s22 = scalar_lea.vmem %s857_s4, %s630_s27  ;;  %s331_s25 = scalar_lea.vmem %s858_s5, %s630_s27 }
  0x19   : > { %v377_v2 = vadd.f32 %v376_v56, %v361_v51  ;;  %v389_v4 = vadd.f32 %v388_v52, %v373_v57  ;;  %v451_v6 = vmul.f32 %v687_v62, %v645_v60  ;;  %v392_v7 = vadd.f32 %v391_v63, %v390_v46 }
  0x1a   : > { %v407_v8 = vmul.f32 %v680_v35, %v639_v18  ;;  %v422_v9 = vmul.f32 %v683_v43, %v640_v23  ;;  %v423_v10 = vmul.f32 %v682_v42, %v641_v24  ;;  %v436_v13 = vsub.f32 %v433_v59, %v435_v1 }
  0x1b   : > { %v405_v11 = vadd.f32 %v404_v58, %v389_v4  ;;  %v393_v14 = vadd.f32 %v392_v7, %v377_v2  ;;  %v438_v15 = vmul.f32 %v685_v55, %v642_v31  ;;  %v439_v20 = vmul.f32 %v684_v50, %v643_v37 }
  0x1c   : > { %v408_v16 = vadd.f32 %v407_v8, %v406_v3  ;;  %v424_v19 = vadd.f32 %v423_v10, %v422_v9  ;;  %v454_v12 = vmul.f32 %v687_v62, %v644_v44  ;;  %v452_v22 = vsub.f32 %v449_v5, %v451_v6 }
  0x1d   : > { %v421_v21 = vadd.f32 %v420_v0, %v405_v11  ;;  %v455_v17 = vmul.f32 %v686_v61, %v645_v60  ;;  %v440_v26 = vadd.f32 %v439_v20, %v438_v15 }
  0x1e   : > { %v409_v25 = vadd.f32 %v408_v16, %v393_v14 }
  0x1f   : > { %v437_v27 = vadd.f32 %v436_v13, %v421_v21  ;;  %v456_v23 = vadd.f32 %v455_v17, %v454_v12 }
  0x20   : > { %v425_v18 = vadd.f32 %v424_v19, %v409_v25 }
  0x21   : > { %v453_v24 = vadd.f32 %v452_v22, %v437_v27 }
  0x22   : > { %v441_v28 = vadd.f32 %v440_v26, %v425_v18 }
  0x23   : > { %458 = vst [vmem:[%s324_s22] sm:$0xf] %v453_v24 }
  0x24   : > { %v457_v29 = vadd.f32 %v456_v23, %v441_v28 }
  0x26   : > { %459 = vst [vmem:[%s331_s25] sm:$0xf] %v457_v29 }
  0x27 PF: > { %s16_s20 = sadd.s32 1, %s710_s20   ;;  %s859_s18 = smov %s706_s19 }
  0x28   : > { %p13_p5 = scmp.ge.s32.totalorder %s16_s20, 4   ;;  %s860_s19 = smov %s862_s21 }
  0x2a   :  { %15 = sbr.rel (!%p13_p5) target bundleno = 2 (0x2), region = 101 }

// kernel: reverse.2
= control target key start
LH: loop header
LB: loop body
LE: loop exit
PB: predicated region body
PF: predicated region fallthrough
CT: control target
= control target key end

     0   :  { %s296_s0 = inlined_call_operand.vmem [shape: f32[2,4,8,8,3], index: 0, kind: input, shape index: {}]   ;;  %s297_s1 = inlined_call_operand.vmem [shape: f32[2,4,8,8,3], index: 1, kind: output, shape index: {}]  }
   0x1   :  { %v96_v0 = vld [vmem:[%s296_s0 + $0x10] sm:$0xff]  ;;  %v99_v2 = vld [vmem:[%s296_s0 + $0x28] sm:$0xff]  ;;  %v103_v4 = vld [vmem:[%s296_s0 + $0x40] sm:$0xff] }
   0x2   :  { %v97_v1 = vld [vmem:[%s296_s0 + $0x70] sm:$0xff]  ;;  %4 = vst [vmem:[%s297_s1] sm:$0xff] %v96_v0  ;;  %v101_v3 = vld [vmem:[%s296_s0 + $0x88] sm:$0xff]  ;;  %v105_v5 = vld [vmem:[%s296_s0 + $0xa0] sm:$0xff] }
   0x3   :  { %98 = vst [vmem:[%s297_s1 + $0x60] sm:$0xff] %v97_v1  ;;  %v107_v6 = vld [vmem:[%s296_s0 + $0x58] sm:$0xff]  ;;  %v111_v8 = vld [vmem:[%s296_s0 + $0x8] sm:$0xff]  ;;  %v115_v10 = vld [vmem:[%s296_s0 + $0x20] sm:$0xff] }
   0x4   :  { %100 = vst [vmem:[%s297_s1 + $0x18] sm:$0xff] %v99_v2  ;;  %v109_v7 = vld [vmem:[%s296_s0 + $0xb8] sm:$0xff]  ;;  %v113_v9 = vld [vmem:[%s296_s0 + $0x68] sm:$0xff]  ;;  %v117_v11 = vld [vmem:[%s296_s0 + $0x80] sm:$0xff] }
   0x5   :  { %102 = vst [vmem:[%s297_s1 + $0x78] sm:$0xff] %v101_v3  ;;  %v119_v12 = vld [vmem:[%s296_s0 + $0x38] sm:$0xff]  ;;  %v123_v14 = vld [vmem:[%s296_s0 + $0x50] sm:$0xff]  ;;  %v65_v16 = vld [vmem:[%s296_s0] sm:$0xff] }
   0x6   :  { %104 = vst [vmem:[%s297_s1 + $0x30] sm:$0xff] %v103_v4  ;;  %v121_v13 = vld [vmem:[%s296_s0 + $0x98] sm:$0xff]  ;;  %v125_v15 = vld [vmem:[%s296_s0 + $0xb0] sm:$0xff]  ;;  %v128_v17 = vld [vmem:[%s296_s0 + $0x60] sm:$0xff] }
   0x7   :  { %106 = vst [vmem:[%s297_s1 + $0x90] sm:$0xff] %v105_v5  ;;  %v130_v18 = vld [vmem:[%s296_s0 + $0x18] sm:$0xff]  ;;  %v134_v20 = vld [vmem:[%s296_s0 + $0x30] sm:$0xff]  ;;  %v138_v22 = vld [vmem:[%s296_s0 + $0x48] sm:$0xff] }
   0x8   :  { %108 = vst [vmem:[%s297_s1 + $0x48] sm:$0xff] %v107_v6  ;;  %v132_v19 = vld [vmem:[%s296_s0 + $0x78] sm:$0xff]  ;;  %v136_v21 = vld [vmem:[%s296_s0 + $0x90] sm:$0xff]  ;;  %v140_v23 = vld [vmem:[%s296_s0 + $0xa8] sm:$0xff] }
   0x9   :  { %110 = vst [vmem:[%s297_s1 + $0xa8] sm:$0xff] %v109_v7 }
   0xa   :  { %112 = vst [vmem:[%s297_s1 + $0x8] sm:$0xff] %v111_v8 }
   0xb   :  { %114 = vst [vmem:[%s297_s1 + $0x68] sm:$0xff] %v113_v9 }
   0xc   :  { %116 = vst [vmem:[%s297_s1 + $0x20] sm:$0xff] %v115_v10 }
   0xd   :  { %118 = vst [vmem:[%s297_s1 + $0x80] sm:$0xff] %v117_v11 }
   0xe   :  { %120 = vst [vmem:[%s297_s1 + $0x38] sm:$0xff] %v119_v12 }
   0xf   :  { %122 = vst [vmem:[%s297_s1 + $0x98] sm:$0xff] %v121_v13 }
  0x10   :  { %124 = vst [vmem:[%s297_s1 + $0x50] sm:$0xff] %v123_v14 }
  0x11   :  { %126 = vst [vmem:[%s297_s1 + $0xb0] sm:$0xff] %v125_v15 }
  0x12   :  { %127 = vst [vmem:[%s297_s1 + $0x10] sm:$0xff] %v65_v16 }
  0x13   :  { %129 = vst [vmem:[%s297_s1 + $0x70] sm:$0xff] %v128_v17 }
  0x14   :  { %131 = vst [vmem:[%s297_s1 + $0x28] sm:$0xff] %v130_v18 }
  0x15   :  { %133 = vst [vmem:[%s297_s1 + $0x88] sm:$0xff] %v132_v19 }
  0x16   :  { %135 = vst [vmem:[%s297_s1 + $0x40] sm:$0xff] %v134_v20 }
  0x17   :  { %137 = vst [vmem:[%s297_s1 + $0xa0] sm:$0xff] %v136_v21 }
  0x18   :  { %139 = vst [vmem:[%s297_s1 + $0x58] sm:$0xff] %v138_v22 }
  0x19   :  { %141 = vst [vmem:[%s297_s1 + $0xb8] sm:$0xff] %v140_v23 }

// kernel: fno3d_mae_forward.29
= control target key start
LH: loop header
LB: loop body
LE: loop exit
PB: predicated region body
PF: predicated region fallthrough
CT: control target
= control target key end

     0   :  { %s601_s15 = smov 0   ;;  %s603_s16 = smov 0   ;;  %s655_s0 = inlined_call_operand.vmem [shape: f32[2,8,512], index: 0, kind: input, shape index: {}]   ;;  %s656_s1 = inlined_call_operand.vmem [shape: f32[4,8], index: 1, kind: input, shape index: {}]   ;;  %s657_s2 = inlined_call_operand.vmem [shape: f32[4,1], index: 2, kind: input, shape index: {}]   ;;  %s658_s3 = inlined_call_operand.vmem [shape: f32[2,4,512], index: 3, kind: input, shape index: {}]   ;;  %s659_s4 = inlined_call_operand.vmem [shape: f32[2,4,512], index: 4, kind: output, shape index: {}]  }
   0x1   :  { %s605_s17 = smov 0  }
   0x2 LB: > { %s26_s18 = sadd.s32 1, %s569_s16  ;;  %p509_p0 = scmp.ge.s32.totalorder %s573_s17, 1  ;;  %s573_s17 = sphi %s605_s17, %s14_s17   ;;  %s569_s16 = sphi %s603_s16, %s661_s16   ;;  %s565_s15 = sphi %s601_s15, %s660_s15  }
   0x3   : > { %p28_p1 = scmp.ge.s32.totalorder %s26_s18, 2  ;;  %p200_p2 = scmp.lt.s32.totalorder %s573_s17, 3 }
   0x5   : > { %s663_s18 = smov (%p28_p1, %s26_s18), 0  ;;  %p201_p3 = pnand %p509_p0, %p200_p2 }
   0x6   : > { %p244_p4 = scmp.lt.s32.totalorder (!%p201_p3), %s565_s15, 1 }
   0x7   : > { %204 = sbr.rel (%p201_p3) target bundleno = 158 (0x9e), region = 36 }
   0xc   : > { %v575_v0 = vmov 0   ;;  %v278_v1 = vld [vmem:[%s657_s2] sm:$0xf]  ;;  %s665_s15 = smov (!%p244_p4, %s565_s15), 1  ;;  %vm284_vm0 = vcmask 64512   ;;  %vm393_vm1 = vcmask 1043456  }
   0xd   : > { %550 = vset.pattern.permute.xlu0 %v575_v0  ;;  %s522_s21 = sshll.u32 %s665_s15, 5  ;;  %s523_s22 = sshll.u32 %s665_s15, 4  ;;  %v273_v2 = vld [vmem:[%s656_s1] sm:$0xf] }
   0xe   : > { %281 = vperm.xlu0 %550, %v278_v1   ;;  %s251_s25 = scalar_lea.vmem %s655_s0, %s522_s21  ;;  %s261_s28 = scalar_lea.vmem %s658_s3, %s523_s22 }
   0xf   : > { %v276_v3 = vld [vmem:[%s251_s25 + $0x10] sm:$0xff]  ;;  %v368_v4 = vld [vmem:[%s261_s28] sm:$0xff]  ;;  %v369_v5 = vld [vmem:[%s261_s28 + $0x8] sm:$0xff]  ;;  %s271_s7 = scalar_lea.vmem %s659_s4, %s523_s22 }
  0x10   : > { %343 = vmatpush.msra.mxu2 %v276_v3  ;;  %372 = vst [vmem:[#allocation1] ss:$2 sm:$0xff] %v368_v4  ;;  %v277_v6 = vld [vmem:[%s251_s25 + $0x18] sm:$0xff]  ;;  %v275_v7 = vld [vmem:[%s251_s25 + $0x8] sm:$0xff]  ;;  %v274_v8 = vld [vmem:[%s251_s25] sm:$0xff] }
  0x11   : > { %374 = vst [vmem:[#allocation1 + $0x10] ss:$2 sm:$0xff] %v369_v5  ;;  %363 = vmatpush.msra.mxu3 %v277_v6  ;;  %518 = vmatmul.msk.f32.vlgmr.msra.gmra.mxu2 %vm284_vm0, %v273_v2 }
  0x12   : > { %519 = vmatmul.msk.f32.vlgmr.msra.gmra.mxu3 %vm284_vm0, %v273_v2  ;;  %323 = vmatpush.msra.mxu1 %v275_v7 }
  0x13   : > { %517 = vmatmul.msk.f32.vlgmr.msra.gmra.mxu1 %vm284_vm0, %v273_v2  ;;  %303 = vmatpush.msra.mxu0 %v274_v8 }
  0x14   : > { %516 = vmatmul.msk.f32.vlgmr.msra.gmra.mxu0 %vm284_vm0, %v273_v2 }
  0x17   : > { %v376_v11 = vld.sshfl [vmem:[#allocation1 + $0x8] sm:$0xff pattern:$0x75316420]  ;;  %v375_v14 = vld.sshfl [vmem:[#allocation1] sm:$0xff pattern:$0x75316420] }
  0x18   : > { %v378_v21 = vld.sshfl [vmem:[#allocation1 + $0x18] sm:$0xff pattern:$0x75316420]  ;;  %v377_v25 = vld.sshfl [vmem:[#allocation1 + $0x10] sm:$0xff pattern:$0x75316420] }
  0x80   : > { %v282_v9 = vpop.permute.xlu0 %281 }
  0x90   : > { %v325_v10 = vpop.f32.mrf.mxu1 }
  0x91   : > { %v326_v12 = vadd.f32 %v325_v10, %v282_v9  ;;  %v305_v13 = vpop.f32.mrf.mxu0 }
  0x92   : > { %v306_v15 = vadd.f32 %v305_v13, %v282_v9 }
  0x93   : > { %v384_v16 = vadd.f32 %v376_v11, %v326_v12 }
  0x94   : > { %v383_v17 = vadd.f32 %v375_v14, %v306_v15  ;;  %v345_v18 = vpop.f32.mrf.mxu2 }
  0x95   : > { %v391_v19 = vrot.slane %v384_v16, 4  ;;  %v365_v20 = vpop.f32.mrf.mxu3  ;;  %v346_v22 = vadd.f32 %v345_v18, %v282_v9 }
  0x96   : > { %v366_v23 = vadd.f32 %v365_v20, %v282_v9 }
  0x97   : > { %v394_v24 = vsel %vm393_vm1, %v383_v17, %v391_v19  ;;  %v385_v27 = vadd.f32 %v377_v25, %v346_v22 }
  0x98   : > { %398 = vst [vmem:[%s271_s7] sm:$0xff] %v394_v24  ;;  %v386_v26 = vadd.f32 %v378_v21, %v366_v23 }
  0x9a   : > { %v392_v28 = vrot.slane %v386_v26, 4 }
  0x9c   : > { %v395_v29 = vsel %vm393_vm1, %v385_v27, %v392_v28 }
  0x9d   : > { %399 = vst [vmem:[%s271_s7 + $0x8] sm:$0xff] %v395_v29 }
  0x9e PF: > { %s14_s17 = sadd.s32 1, %s573_s17   ;;  %s660_s15 = smov %s569_s16 }
  0x9f   : > { %p11_p5 = scmp.ge.s32.totalorder %s14_s17, 4   ;;  %s661_s16 = smov %s663_s18 }
  0xa1   :  { %13 = sbr.rel (!%p11_p5) target bundleno = 2 (0x2), region = 70 }

</bundles_post_ra>
